<compile_context>
chip_gen: v7x
topology: tpu7x:2x2x1
jax: 0.10.0
libtpu: 0.0.40
codegen_flags: <defaults>
</compile_context>

<pallas_src>
import functools

import jax
import jax.numpy as jnp
from jax.experimental import pallas as pl
from jax.experimental.pallas import tpu as pltpu


def _round_up(x, m):
    return (x + m - 1) // m * m


def _vmem_limit_bytes():
    # ~75% of physical per-core VMEM, capped at 96 MiB (v5e/v6e: 128 MiB physical,
    # v7x: 64 MiB physical -> ~48 MiB usable).  Falls back to a v7x-safe value.
    try:
        cap = int(pltpu.get_tpu_info().vmem_capacity_bytes)
    except Exception:
        cap = 64 * 1024 * 1024
    return min(cap * 3 // 4, 96 * 1024 * 1024)


def _ds_conv_kernel(x_ref, dww_ref, b1_ref, pww_ref, b2_ref, o_ref,
                    *, gB, tH, nT, W, Cp, K, pad, has_residual):
    # x_ref: (gB, Hpad, Wp8, Cp) bf16 -- whole padded image(s), lane-dense channels.
    halo = K - 1

    def compute_tile(row0):
        acc = jnp.zeros((gB, tH, W, Cp), jnp.float32)
        resid = None
        for j in range(K):
            # One W-shifted, f32-cast slab per j (K slabs per row tile instead of
            # K*K shifted slices).  Row shifts below slice dim 1, which sits above
            # the (sublane, lane) tile, so they are free; only the j-shift touches
            # the sublane dim.
            slab = x_ref[:, pl.ds(row0, tH + halo), j:j + W, :].astype(jnp.float32)
            for i in range(K):
                # BN1 scale is pre-folded into dww in the wrapper.
                acc = acc + slab[:, i:i + tH] * dww_ref[i, j]
            if has_residual and j == pad:
                # Centre of the halo slab == original input rows/cols for this tile:
                # no second HBM stream for the shortcut.
                resid = slab[:, pad:pad + tH]
        # Folded BN1 bias + ReLU (interior width only).
        y = jnp.maximum(acc + b1_ref[0], 0.0)
        # Pointwise 1x1 conv == matmul over channels on the MXU.  Keep the operand
        # 4-D (no reshape -> no relayout copies when W is not a multiple of 8).
        z = jax.lax.dot_general(
            y.astype(jnp.bfloat16), pww_ref[...],
            dimension_numbers=(((3,), (0,)), ((), ())),
            preferred_element_type=jnp.float32)
        z = z + b2_ref[0]                       # folded BN2 bias, no pw activation
        if has_residual:
            z = z + resid
        o_ref[:, pl.ds(row0, tH), :, :] = z.astype(o_ref.dtype)

    if nT == 1:
        compute_tile(0)
    else:
        def body(t, carry):
            compute_tile(pl.multiple_of(t * tH, tH))
            return carry
        jax.lax.fori_loop(0, nT, body, 0)


@functools.partial(jax.jit, static_argnames=("dw_kernel_size", "row_tile",
                                              "batch_tile", "has_residual"))
def depthwise_separable_conv(x_nchw, params, *, dw_kernel_size=3, row_tile=None,
                             batch_tile=None, has_residual=None):
    """x_nchw: (B, C, H, W) float32.  Returns (B, C_out, H, W) float32."""
    K = dw_kernel_size
    assert K % 2 == 1, "only odd depthwise kernel sizes are supported"
    pad = K // 2
    B, C, H, W = x_nchw.shape
    dw_w = params["dw_w"]                       # (K, K, C)
    pw_w = params["pw_w"]                       # (C, Cout)
    Cout = pw_w.shape[1]
    eps = 1e-5
    if has_residual is None:
        has_residual = (C == Cout)              # stride == 1 in this kernel
    if has_residual:
        assert C == Cout, "residual requires in_chs == out_chs"

    # ---- lane-dense channel padding (multiples of 128) ------------------------------
    Cp = _round_up(C, 128)
    Coutp = _round_up(Cout, 128)

    # ---- fold BatchNorm (eval mode, running stats) into the conv weights ------------
    s1 = params["bn1_gamma"] * jax.lax.rsqrt(params["bn1_var"] + eps)
    b1 = params["bn1_beta"] - params["bn1_mean"] * s1
    s2 = params["bn2_gamma"] * jax.lax.rsqrt(params["bn2_var"] + eps)
    b2 = params["bn2_beta"] - params["bn2_mean"] * s2

    dww = jnp.pad((dw_w * s1[None, None, :]).astype(jnp.float32),
                  ((0, 0), (0, 0), (0, Cp - C)))                        # (K, K, Cp) f32
    pww = jnp.pad((pw_w * s2[None, :]).astype(jnp.bfloat16),
                  ((0, Cp - C), (0, Coutp - Cout)))                     # (Cp, Coutp) bf16
    b1p = jnp.pad(b1.astype(jnp.float32), (0, Cp - C)).reshape(1, Cp)
    b2p = jnp.pad(b2.astype(jnp.float32), (0, Coutp - Cout)).reshape(1, Coutp)

    # ---- spatial layout --------------------------------------------------------------
    vmem_limit = _vmem_limit_bytes()
    Wp8 = _round_up(W + 2 * pad, 8)             # sublane-aligned padded width

    if row_tile is None:
        # Bound the f32 temporaries (acc / slab / resid / y / z ~ 6 row-tile slabs)
        # to ~8 MiB per row tile; cap at 32 rows.
        budget_rows = (8 * 1024 * 1024) // (6 * W * max(Cp, Coutp) * 4)
        row_tile = max(8, min(32, budget_rows))
    tH = min(row_tile, H)
    nT = -(-H // tH)                            # cdiv
    Ht = nT * tH                                # H rounded up to a row-tile multiple
    Hpad = Ht + 2 * pad

    # ---- batch grouping: amortize per-step overhead, keep the pipeline alive --------
    in_img = Hpad * Wp8 * Cp * 2                # bf16 input block, per image
    out_img = Ht * W * Coutp * 2                # bf16 output block, per image
    tmp_img = 6 * tH * W * max(Cp, Coutp) * 4   # f32 in-kernel temporaries, per image
    w_bytes = 2 * (K * K * Cp * 4 + Cp * 4 + Cp * Coutp * 2 + Coutp * 4)  # 2x: double buffered
    if batch_tile is None:
        budget = max(vmem_limit * 6 // 10 - w_bytes, in_img)
        per_img = 2 * (in_img + out_img) + tmp_img
        g_cap = max(1, budget // per_img)
        # >= 2 grid steps per v7x TensorCore (>= 4 total) whenever the batch allows.
        g_cap = min(g_cap, max(1, B // min(B, 4)))
        gB = 1
        for d in range(1, min(B, int(g_cap)) + 1):
            if B % d == 0:
                gB = d
    else:
        gB = batch_tile
    assert B % gB == 0, "batch_tile must divide the batch size"

    # NCHW -> NHWC, bf16 stream, SAME pad + row/sublane alignment pad + channel pad.
    # This fused prologue is the only extra HBM pass on the activation; the kernel
    # reads the padded array directly (no pre-tiled intermediate).
    x = jnp.transpose(x_nchw, (0, 2, 3, 1)).astype(jnp.bfloat16)
    x = jnp.pad(x, ((0, 0), (pad, pad + Ht - H), (pad, Wp8 - W - pad), (0, Cp - C)))

    kernel = functools.partial(
        _ds_conv_kernel, gB=gB, tH=tH, nT=nT, W=W, Cp=Cp, K=K, pad=pad,
        has_residual=bool(has_residual))

    n_px = B * Ht * W
    cost = pl.CostEstimate(
        flops=2 * n_px * Cp * Coutp + 2 * K * K * n_px * Cp,
        transcendentals=0,
        bytes_accessed=(B * Hpad * Wp8 * Cp * 2 + B * Ht * W * Coutp * 2
                        + Cp * Coutp * 2 + K * K * Cp * 4))

    out = pl.pallas_call(
        kernel,
        out_shape=jax.ShapeDtypeStruct((B, Ht, W, Coutp), jnp.bfloat16),
        grid_spec=pltpu.PrefetchScalarGridSpec(
            num_scalar_prefetch=0,
            grid=(B // gB,),
            in_specs=[
                pl.BlockSpec((gB, Hpad, Wp8, Cp), lambda n: (n, 0, 0, 0)),   # activations
                pl.BlockSpec((K, K, Cp), lambda n: (0, 0, 0)),               # dw weight (x BN1 scale)
                pl.BlockSpec((1, Cp), lambda n: (0, 0)),                     # BN1 bias
                pl.BlockSpec((Cp, Coutp), lambda n: (0, 0)),                 # pw weight (x BN2 scale)
                pl.BlockSpec((1, Coutp), lambda n: (0, 0)),                  # BN2 bias
            ],
            out_specs=pl.BlockSpec((gB, Ht, W, Coutp), lambda n: (n, 0, 0, 0)),
        ),
        compiler_params=pltpu.CompilerParams(
            dimension_semantics=("parallel",),
            vmem_limit_bytes=vmem_limit),
        cost_estimate=cost,
    )(x, dww, b1p, pww, b2p)

    # Strip row / channel padding, back to NCHW float32.
    out = out[:, :H, :, :Cout]
    return jnp.transpose(out, (0, 3, 1, 2)).astype(jnp.float32)


def make_params(key, in_chs, out_chs, dw_kernel_size=3):
    ks = jax.random.split(key, 8)
    K = dw_kernel_size
    return {
        # depthwise conv weight: PyTorch shape (C,1,K,K) -> stored here as (K,K,C)
        "dw_w": 0.1 * jax.random.normal(ks[0], (K, K, in_chs), jnp.float32),
        # pointwise conv weight: PyTorch shape (Cout,C,1,1) -> stored as (C,Cout)
        "pw_w": 0.1 * jax.random.normal(ks[1], (in_chs, out_chs), jnp.float32),
        "bn1_gamma": 1.0 + 0.1 * jax.random.normal(ks[2], (in_chs,), jnp.float32),
        "bn1_beta": 0.1 * jax.random.normal(ks[3], (in_chs,), jnp.float32),
        "bn1_mean": 0.05 * jax.random.normal(ks[4], (in_chs,), jnp.float32),
        "bn1_var": jnp.abs(1.0 + 0.1 * jax.random.normal(ks[5], (in_chs,), jnp.float32)),
        "bn2_gamma": 1.0 + 0.1 * jax.random.normal(ks[6], (out_chs,), jnp.float32),
        "bn2_beta": 0.1 * jax.random.normal(ks[7], (out_chs,), jnp.float32),
        "bn2_mean": jnp.zeros((out_chs,), jnp.float32),
        "bn2_var": jnp.ones((out_chs,), jnp.float32),
    }


def _reference(x_nchw, params, dw_kernel_size=3):
    """Pure-JAX f32 reference (lax conv) for a sanity check (residual path)."""
    eps = 1e-5
    C = x_nchw.shape[1]
    dw = jnp.transpose(params["dw_w"], (2, 0, 1))[:, None, :, :]    # (C,1,K,K)
    y = jax.lax.conv_general_dilated(
        x_nchw, dw, window_strides=(1, 1), padding="SAME",
        feature_group_count=C,
        dimension_numbers=("NCHW", "OIHW", "NCHW"))
    s1 = (params["bn1_gamma"] / jnp.sqrt(params["bn1_var"] + eps))[None, :, None, None]
    b1 = (params["bn1_beta"] - params["bn1_mean"] *
          params["bn1_gamma"] / jnp.sqrt(params["bn1_var"] + eps))[None, :, None, None]
    y = jnp.maximum(y * s1 + b1, 0.0)
    pw = jnp.transpose(params["pw_w"], (1, 0))[:, :, None, None]    # (Cout,C,1,1)
    z = jax.lax.conv_general_dilated(
        y, pw, window_strides=(1, 1), padding="VALID",
        dimension_numbers=("NCHW", "OIHW", "NCHW"))
    s2 = (params["bn2_gamma"] / jnp.sqrt(params["bn2_var"] + eps))[None, :, None, None]
    b2 = (params["bn2_beta"] - params["bn2_mean"] *
          params["bn2_gamma"] / jnp.sqrt(params["bn2_var"] + eps))[None, :, None, None]
    z = z * s2 + b2
    return z + x_nchw


if __name__ == "__main__":
    key = jax.random.PRNGKey(0)
    kx, kp = jax.random.split(key)
    B, C, H, W = 2, 4, 16, 16          # in_chs == out_chs -> residual path active
    x = jax.random.normal(kx, (B, C, H, W), jnp.float32)
    params = make_params(kp, in_chs=C, out_chs=C, dw_kernel_size=3)

    ref = jax.block_until_ready(_reference(x, params, dw_kernel_size=3))

    # Default path: whole image per grid step (nT = 1).
    out = jax.block_until_ready(depthwise_separable_conv(x, params, dw_kernel_size=3))
    assert out.shape == (B, C, H, W)
    # bf16 streaming of activations / pw weight / output -> bf16-level tolerance.
    assert jnp.max(jnp.abs(out - ref)) < 5e-2, "mismatch vs reference (default tiling)"

    # Row-tiled path (nT = 2) to exercise the in-kernel row loop.
    out2 = jax.block_until_ready(
        depthwise_separable_conv(x, params, dw_kernel_size=3, row_tile=8))
    assert out2.shape == (B, C, H, W)
    assert jnp.max(jnp.abs(out2 - ref)) < 5e-2, "mismatch vs reference (row tiling)"

    print("KERNEL_OK")
</pallas_src>

<mosaic_0001>
module attributes {stable_mosaic.version = 11 : i64} {
  func.func @_ds_conv_kernel(%arg0: i32, %arg1: memref<1x18x24x128xbf16, #tpu.memory_space<vmem>>, %arg2: memref<3x3x128xf32, #tpu.memory_space<vmem>>, %arg3: memref<1x128xf32, #tpu.memory_space<vmem>>, %arg4: memref<128x128xbf16, #tpu.memory_space<vmem>>, %arg5: memref<1x128xf32, #tpu.memory_space<vmem>>, %arg6: memref<1x16x16x128xbf16, #tpu.memory_space<vmem>>) attributes {dimension_semantics = [#tpu.dimension_semantics<parallel>], iteration_bounds = array<i64: 2>, scalar_prefetch = 0 : i64, scratch_operands = 0 : i64, tpu.core_type = #tpu.core_type<tc>, window_params = [{transform_indices = @transform_0, window_bounds = array<i64: 1, 18, 24, 128>}, {pipeline_mode = #tpu.pipeline_mode<synchronous>, transform_indices = @transform_1, window_bounds = array<i64: 3, 3, 128>}, {pipeline_mode = #tpu.pipeline_mode<synchronous>, transform_indices = @transform_2, window_bounds = array<i64: 1, 128>}, {pipeline_mode = #tpu.pipeline_mode<synchronous>, transform_indices = @transform_3, window_bounds = array<i64: 128, 128>}, {pipeline_mode = #tpu.pipeline_mode<synchronous>, transform_indices = @transform_4, window_bounds = array<i64: 1, 128>}, {transform_indices = @transform_5, window_bounds = array<i64: 1, 16, 16, 128>}]} {
    %cst = arith.constant 0.000000e+00 : f32
    %0 = vector.broadcast %cst : f32 to vector<1x16x16x128xf32>
    %c0 = arith.constant 0 : index
    %c0_0 = arith.constant 0 : index
    %c0_1 = arith.constant 0 : index
    %c0_2 = arith.constant 0 : index
    %1 = vector.load %arg1[%c0, %c0_0, %c0_1, %c0_2] : memref<1x18x24x128xbf16, #tpu.memory_space<vmem>>, vector<1x18x16x128xbf16>
    %2 = arith.extf %1 : vector<1x18x16x128xbf16> to vector<1x18x16x128xf32>
    %3 = vector.extract_strided_slice %2 {offsets = [0, 0, 0, 0], sizes = [1, 16, 16, 128], strides = [1, 1, 1, 1]} : vector<1x18x16x128xf32> to vector<1x16x16x128xf32>
    %c0_3 = arith.constant 0 : index
    %c0_4 = arith.constant 0 : index
    %c0_5 = arith.constant 0 : index
    %4 = vector.load %arg2[%c0_3, %c0_4, %c0_5] : memref<3x3x128xf32, #tpu.memory_space<vmem>>, vector<1x1x128xf32>
    %5 = vector.shape_cast %4 : vector<1x1x128xf32> to vector<128xf32>
    %6 = vector.shape_cast %5 : vector<128xf32> to vector<1x1x1x128xf32>
    %7 = vector.broadcast %6 : vector<1x1x1x128xf32> to vector<1x16x16x128xf32>
    %8 = arith.mulf %3, %7 : vector<1x16x16x128xf32>
    %9 = arith.addf %0, %8 : vector<1x16x16x128xf32>
    %10 = vector.extract_strided_slice %2 {offsets = [0, 1, 0, 0], sizes = [1, 16, 16, 128], strides = [1, 1, 1, 1]} : vector<1x18x16x128xf32> to vector<1x16x16x128xf32>
    %c1 = arith.constant 1 : index
    %c0_6 = arith.constant 0 : index
    %c0_7 = arith.constant 0 : index
    %11 = vector.load %arg2[%c1, %c0_6, %c0_7] : memref<3x3x128xf32, #tpu.memory_space<vmem>>, vector<1x1x128xf32>
    %12 = vector.shape_cast %11 : vector<1x1x128xf32> to vector<128xf32>
    %13 = vector.shape_cast %12 : vector<128xf32> to vector<1x1x1x128xf32>
    %14 = vector.broadcast %13 : vector<1x1x1x128xf32> to vector<1x16x16x128xf32>
    %15 = arith.mulf %10, %14 : vector<1x16x16x128xf32>
    %16 = arith.addf %9, %15 : vector<1x16x16x128xf32>
    %17 = vector.extract_strided_slice %2 {offsets = [0, 2, 0, 0], sizes = [1, 16, 16, 128], strides = [1, 1, 1, 1]} : vector<1x18x16x128xf32> to vector<1x16x16x128xf32>
    %c2 = arith.constant 2 : index
    %c0_8 = arith.constant 0 : index
    %c0_9 = arith.constant 0 : index
    %18 = vector.load %arg2[%c2, %c0_8, %c0_9] : memref<3x3x128xf32, #tpu.memory_space<vmem>>, vector<1x1x128xf32>
    %19 = vector.shape_cast %18 : vector<1x1x128xf32> to vector<128xf32>
    %20 = vector.shape_cast %19 : vector<128xf32> to vector<1x1x1x128xf32>
    %21 = vector.broadcast %20 : vector<1x1x1x128xf32> to vector<1x16x16x128xf32>
    %22 = arith.mulf %17, %21 : vector<1x16x16x128xf32>
    %23 = arith.addf %16, %22 : vector<1x16x16x128xf32>
    %c0_10 = arith.constant 0 : index
    %c0_11 = arith.constant 0 : index
    %c1_12 = arith.constant 1 : index
    %c0_13 = arith.constant 0 : index
    %24 = vector.load %arg1[%c0_10, %c0_11, %c1_12, %c0_13] : memref<1x18x24x128xbf16, #tpu.memory_space<vmem>>, vector<1x18x16x128xbf16>
    %25 = arith.extf %24 : vector<1x18x16x128xbf16> to vector<1x18x16x128xf32>
    %26 = vector.extract_strided_slice %25 {offsets = [0, 0, 0, 0], sizes = [1, 16, 16, 128], strides = [1, 1, 1, 1]} : vector<1x18x16x128xf32> to vector<1x16x16x128xf32>
    %c0_14 = arith.constant 0 : index
    %c1_15 = arith.constant 1 : index
    %c0_16 = arith.constant 0 : index
    %27 = vector.load %arg2[%c0_14, %c1_15, %c0_16] : memref<3x3x128xf32, #tpu.memory_space<vmem>>, vector<1x1x128xf32>
    %28 = vector.shape_cast %27 : vector<1x1x128xf32> to vector<128xf32>
    %29 = vector.shape_cast %28 : vector<128xf32> to vector<1x1x1x128xf32>
    %30 = vector.broadcast %29 : vector<1x1x1x128xf32> to vector<1x16x16x128xf32>
    %31 = arith.mulf %26, %30 : vector<1x16x16x128xf32>
    %32 = arith.addf %23, %31 : vector<1x16x16x128xf32>
    %33 = vector.extract_strided_slice %25 {offsets = [0, 1, 0, 0], sizes = [1, 16, 16, 128], strides = [1, 1, 1, 1]} : vector<1x18x16x128xf32> to vector<1x16x16x128xf32>
    %c1_17 = arith.constant 1 : index
    %c1_18 = arith.constant 1 : index
    %c0_19 = arith.constant 0 : index
    %34 = vector.load %arg2[%c1_17, %c1_18, %c0_19] : memref<3x3x128xf32, #tpu.memory_space<vmem>>, vector<1x1x128xf32>
    %35 = vector.shape_cast %34 : vector<1x1x128xf32> to vector<128xf32>
    %36 = vector.shape_cast %35 : vector<128xf32> to vector<1x1x1x128xf32>
    %37 = vector.broadcast %36 : vector<1x1x1x128xf32> to vector<1x16x16x128xf32>
    %38 = arith.mulf %33, %37 : vector<1x16x16x128xf32>
    %39 = arith.addf %32, %38 : vector<1x16x16x128xf32>
    %40 = vector.extract_strided_slice %25 {offsets = [0, 2, 0, 0], sizes = [1, 16, 16, 128], strides = [1, 1, 1, 1]} : vector<1x18x16x128xf32> to vector<1x16x16x128xf32>
    %c2_20 = arith.constant 2 : index
    %c1_21 = arith.constant 1 : index
    %c0_22 = arith.constant 0 : index
    %41 = vector.load %arg2[%c2_20, %c1_21, %c0_22] : memref<3x3x128xf32, #tpu.memory_space<vmem>>, vector<1x1x128xf32>
    %42 = vector.shape_cast %41 : vector<1x1x128xf32> to vector<128xf32>
    %43 = vector.shape_cast %42 : vector<128xf32> to vector<1x1x1x128xf32>
    %44 = vector.broadcast %43 : vector<1x1x1x128xf32> to vector<1x16x16x128xf32>
    %45 = arith.mulf %40, %44 : vector<1x16x16x128xf32>
    %46 = arith.addf %39, %45 : vector<1x16x16x128xf32>
    %47 = vector.extract_strided_slice %25 {offsets = [0, 1, 0, 0], sizes = [1, 16, 16, 128], strides = [1, 1, 1, 1]} : vector<1x18x16x128xf32> to vector<1x16x16x128xf32>
    %c0_23 = arith.constant 0 : index
    %c0_24 = arith.constant 0 : index
    %c2_25 = arith.constant 2 : index
    %c0_26 = arith.constant 0 : index
    %48 = vector.load %arg1[%c0_23, %c0_24, %c2_25, %c0_26] : memref<1x18x24x128xbf16, #tpu.memory_space<vmem>>, vector<1x18x16x128xbf16>
    %49 = arith.extf %48 : vector<1x18x16x128xbf16> to vector<1x18x16x128xf32>
    %50 = vector.extract_strided_slice %49 {offsets = [0, 0, 0, 0], sizes = [1, 16, 16, 128], strides = [1, 1, 1, 1]} : vector<1x18x16x128xf32> to vector<1x16x16x128xf32>
    %c0_27 = arith.constant 0 : index
    %c2_28 = arith.constant 2 : index
    %c0_29 = arith.constant 0 : index
    %51 = vector.load %arg2[%c0_27, %c2_28, %c0_29] : memref<3x3x128xf32, #tpu.memory_space<vmem>>, vector<1x1x128xf32>
    %52 = vector.shape_cast %51 : vector<1x1x128xf32> to vector<128xf32>
    %53 = vector.shape_cast %52 : vector<128xf32> to vector<1x1x1x128xf32>
    %54 = vector.broadcast %53 : vector<1x1x1x128xf32> to vector<1x16x16x128xf32>
    %55 = arith.mulf %50, %54 : vector<1x16x16x128xf32>
    %56 = arith.addf %46, %55 : vector<1x16x16x128xf32>
    %57 = vector.extract_strided_slice %49 {offsets = [0, 1, 0, 0], sizes = [1, 16, 16, 128], strides = [1, 1, 1, 1]} : vector<1x18x16x128xf32> to vector<1x16x16x128xf32>
    %c1_30 = arith.constant 1 : index
    %c2_31 = arith.constant 2 : index
    %c0_32 = arith.constant 0 : index
    %58 = vector.load %arg2[%c1_30, %c2_31, %c0_32] : memref<3x3x128xf32, #tpu.memory_space<vmem>>, vector<1x1x128xf32>
    %59 = vector.shape_cast %58 : vector<1x1x128xf32> to vector<128xf32>
    %60 = vector.shape_cast %59 : vector<128xf32> to vector<1x1x1x128xf32>
    %61 = vector.broadcast %60 : vector<1x1x1x128xf32> to vector<1x16x16x128xf32>
    %62 = arith.mulf %57, %61 : vector<1x16x16x128xf32>
    %63 = arith.addf %56, %62 : vector<1x16x16x128xf32>
    %64 = vector.extract_strided_slice %49 {offsets = [0, 2, 0, 0], sizes = [1, 16, 16, 128], strides = [1, 1, 1, 1]} : vector<1x18x16x128xf32> to vector<1x16x16x128xf32>
    %c2_33 = arith.constant 2 : index
    %c2_34 = arith.constant 2 : index
    %c0_35 = arith.constant 0 : index
    %65 = vector.load %arg2[%c2_33, %c2_34, %c0_35] : memref<3x3x128xf32, #tpu.memory_space<vmem>>, vector<1x1x128xf32>
    %66 = vector.shape_cast %65 : vector<1x1x128xf32> to vector<128xf32>
    %67 = vector.shape_cast %66 : vector<128xf32> to vector<1x1x1x128xf32>
    %68 = vector.broadcast %67 : vector<1x1x1x128xf32> to vector<1x16x16x128xf32>
    %69 = arith.mulf %64, %68 : vector<1x16x16x128xf32>
    %70 = arith.addf %63, %69 : vector<1x16x16x128xf32>
    %c0_36 = arith.constant 0 : index
    %c0_37 = arith.constant 0 : index
    %71 = vector.load %arg3[%c0_36, %c0_37] : memref<1x128xf32, #tpu.memory_space<vmem>>, vector<1x128xf32>
    %72 = vector.shape_cast %71 : vector<1x128xf32> to vector<128xf32>
    %73 = vector.shape_cast %72 : vector<128xf32> to vector<1x1x1x128xf32>
    %74 = vector.broadcast %73 : vector<1x1x1x128xf32> to vector<1x16x16x128xf32>
    %75 = arith.addf %70, %74 : vector<1x16x16x128xf32>
    %cst_38 = arith.constant 0.000000e+00 : f32
    %76 = vector.broadcast %cst_38 : f32 to vector<1x16x16x128xf32>
    %77 = arith.maximumf %75, %76 : vector<1x16x16x128xf32>
    %78 = arith.truncf %77 : vector<1x16x16x128xf32> to vector<1x16x16x128xbf16>
    %c0_39 = arith.constant 0 : index
    %c0_40 = arith.constant 0 : index
    %79 = vector.load %arg4[%c0_39, %c0_40] : memref<128x128xbf16, #tpu.memory_space<vmem>>, vector<128x128xbf16>
    %cst_41 = arith.constant dense<0.000000e+00> : vector<1x16x16x128xf32>
    %80 = tpu.matmul %78, %79, %cst_41 {dimension_numbers = #tpu.dot_dimension_numbers<[3], [0], [0, 1, 2], [1], [0, 0, 0, 1, 0, 2, 1, 1], [], []>} : vector<1x16x16x128xbf16>, vector<128x128xbf16>, vector<1x16x16x128xf32> -> vector<1x16x16x128xf32>
    %c0_42 = arith.constant 0 : index
    %c0_43 = arith.constant 0 : index
    %81 = vector.load %arg5[%c0_42, %c0_43] : memref<1x128xf32, #tpu.memory_space<vmem>>, vector<1x128xf32>
    %82 = vector.shape_cast %81 : vector<1x128xf32> to vector<128xf32>
    %83 = vector.shape_cast %82 : vector<128xf32> to vector<1x1x1x128xf32>
    %84 = vector.broadcast %83 : vector<1x1x1x128xf32> to vector<1x16x16x128xf32>
    %85 = arith.addf %80, %84 : vector<1x16x16x128xf32>
    %86 = arith.addf %85, %47 : vector<1x16x16x128xf32>
    %87 = arith.truncf %86 : vector<1x16x16x128xf32> to vector<1x16x16x128xbf16>
    %c0_44 = arith.constant 0 : index
    %c0_45 = arith.constant 0 : index
    %c0_46 = arith.constant 0 : index
    %c0_47 = arith.constant 0 : index
    %88 = vector.load %arg6[%c0_44, %c0_45, %c0_46, %c0_47] : memref<1x16x16x128xbf16, #tpu.memory_space<vmem>>, vector<1x16x16x128xbf16>
    tpu.vector_store %arg6[%c0_44, %c0_45, %c0_46, %c0_47], %87 {strides = array<i32>} : memref<1x16x16x128xbf16, #tpu.memory_space<vmem>>, vector<1x16x16x128xbf16>,
    return
  }
  func.func @transform_0(%arg0: i32) -> (i32, i32, i32, i32) {
    %c0_i32 = arith.constant 0 : i32
    %c0_i32_0 = arith.constant 0 : i32
    %c0_i32_1 = arith.constant 0 : i32
    %c0_i32_2 = arith.constant 0 : i32
    return %arg0, %c0_i32, %c0_i32_0, %c0_i32_1 : i32, i32, i32, i32
  }
  func.func @transform_1(%arg0: i32) -> (i32, i32, i32) {
    %c0_i32 = arith.constant 0 : i32
    %c0_i32_0 = arith.constant 0 : i32
    %c0_i32_1 = arith.constant 0 : i32
    %c0_i32_2 = arith.constant 0 : i32
    return %c0_i32, %c0_i32_0, %c0_i32_1 : i32, i32, i32
  }
  func.func @transform_2(%arg0: i32) -> (i32, i32) {
    %c0_i32 = arith.constant 0 : i32
    %c0_i32_0 = arith.constant 0 : i32
    %c0_i32_1 = arith.constant 0 : i32
    return %c0_i32, %c0_i32_0 : i32, i32
  }
  func.func @transform_3(%arg0: i32) -> (i32, i32) {
    %c0_i32 = arith.constant 0 : i32
    %c0_i32_0 = arith.constant 0 : i32
    %c0_i32_1 = arith.constant 0 : i32
    return %c0_i32, %c0_i32_0 : i32, i32
  }
  func.func @transform_4(%arg0: i32) -> (i32, i32) {
    %c0_i32 = arith.constant 0 : i32
    %c0_i32_0 = arith.constant 0 : i32
    %c0_i32_1 = arith.constant 0 : i32
    return %c0_i32, %c0_i32_0 : i32, i32
  }
  func.func @transform_5(%arg0: i32) -> (i32, i32, i32, i32) {
    %c0_i32 = arith.constant 0 : i32
    %c0_i32_0 = arith.constant 0 : i32
    %c0_i32_1 = arith.constant 0 : i32
    %c0_i32_2 = arith.constant 0 : i32
    return %arg0, %c0_i32, %c0_i32_0, %c0_i32_1 : i32, i32, i32, i32
  }
}

</mosaic_0001>

<bundles_post_ra>
// kernel: depthwise_separable_conv.1
= control target key start
LH: loop header
LB: loop body
LE: loop exit
PB: predicated region body
PF: predicated region fallthrough
CT: control target
= control target key end

     0   :  { %s3295_s18 = smov 0   ;;  %s4877_s0 = inlined_call_operand.vmem [shape: bf16[2,18,24,128], index: 0, kind: input, shape index: {}]   ;;  %s4878_s1 = inlined_call_operand.vmem [shape: f32[3,3,128], index: 1, kind: input, shape index: {}]   ;;  %s4879_s2 = inlined_call_operand.vmem [shape: f32[1,128], index: 2, kind: input, shape index: {}]   ;;  %s4880_s3 = inlined_call_operand.vmem [shape: bf16[128,128], index: 3, kind: input, shape index: {}]   ;;  %s4881_s4 = inlined_call_operand.vmem [shape: f32[1,128], index: 4, kind: input, shape index: {}]   ;;  %s4882_s5 = inlined_call_operand.vmem [shape: bf16[2,16,16,128], index: 5, kind: output, shape index: {}]  }
   0x1 LB: > { %s2849_s19 = sadd.s32 4294967295, %s3263_s18   ;;  %p2853_p0 = scmp.ge.s32.totalorder %s3263_s18, 1  ;;  %s3263_s18 = sphi %s3295_s18, %s15_s18  }
   0x2   : > { %p187_p1 = scmp.lt.s32.totalorder %s3263_s18, 3 }
   0x4   : > { %p188_p2 = pnand %p2853_p0, %p187_p1 }
   0x6   : > { %191 = sbr.rel (%p188_p2) target bundleno = 574 (0x23e), region = 40 }
   0xd   : > { %v3229_v0 = vld [vmem:[%s4880_s3] sm:$0xff]   ;;  %p215_p3 = scmp.lt.s32.totalorder %s2849_s19, 1  ;;  %v3230_v1 = vld [vmem:[%s4880_s3 + $0x8] sm:$0xff]   ;;  %v3231_v2 = vld [vmem:[%s4880_s3 + $0x10] sm:$0xff]   ;;  %vm716_vm0 = vcmask 1046528   ;;  %vm1488_vm1 = vcmask 1045504  }
   0xe   : > { %3156 = vmatprep.subr.bf16.mxu0 %v3229_v0  ;;  %3204 = vmatprep.subr.bf16.mxu1 %v3229_v0  ;;  %v3232_v3 = vld [vmem:[%s4880_s3 + $0x18] sm:$0xff]   ;;  %v3337_v11 = vld [vmem:[%s4878_s1] ss:$0 sm:$0xff]  ;;  %v3342_v12 = vld [vmem:[%s4878_s1 + $0x4] ss:$0 sm:$0xff] }
   0xf   : > { %s4985_s19 = smov (!%p215_p3, %s2849_s19), 1  ;;  %3157 = vmatpush3.bf16.msra.mxu0 %v3229_v0  ;;  %3212 = vmatpush3.bf16.msra.mxu1 %v3229_v0  ;;  %v3347_v13 = vld [vmem:[%s4878_s1 + $0x8] ss:$0 sm:$0xff]  ;;  %v3366_v24 = vld [vmem:[%s4878_s1 + $0x1] ss:$0 sm:$0xff] }
  0x10   : > { %3158 = vmatprep.subr.bf16.mxu0 %v3230_v1  ;;  %3205 = vmatprep.subr.bf16.mxu1 %v3230_v1  ;;  %s3220_s26 = smul.u32 216, %s4985_s19  ;;  %v3233_v25 = vld [vmem:[%s4880_s3 + $0x20] sm:$0xff]   ;;  %v3401_v39 = vld [vmem:[%s4878_s1 + $0x9] ss:$0 sm:$0xff]  ;;  %s2916_s10 = sshll.u32 %s4985_s19, 7 }
  0x11   : > { %v3384_v30 = vld [vmem:[%s4878_s1 + $0x5] ss:$0 sm:$0xff]  ;;  %v3234_v44 = vld [vmem:[%s4880_s3 + $0x28] sm:$0xff]   ;;  %v3427_v0 = vld [vmem:[%s4878_s1 + $0x2] ss:$0 sm:$0xff]  ;;  %s4766_s12 = scalar_lea.vmem %s4882_s5, %s2916_s10 }
  0x12   : > { %s3318_s29 = scalar_lea.vmem %s4877_s0, %s3220_s26 }
  0x13   : > { %3159 = vmatpush3.bf16.msra.mxu0 %v3230_v1  ;;  %3213 = vmatpush3.bf16.msra.mxu1 %v3230_v1  ;;  %v2950_v4 = vld [vmem:[%s3318_s29] sm:$0xff]   ;;  %v3325_v5 = vld [vmem:[%s3318_s29 + $0xc] sm:$0xff]   ;;  %v3101_v6 = vld [vmem:[%s3318_s29 + $0x18] sm:$0xff]  }
  0x14   : > { %3160 = vmatprep.subr.bf16.mxu0 %v3231_v2  ;;  %3206 = vmatprep.subr.bf16.mxu1 %v3231_v2  ;;  %v2951_v7 = vunpack.c.l.bf16 %v2950_v4  ;;  %v3328_v8 = vunpack.c.h.bf16 %v2950_v4  ;;  %v3330_v9 = vunpack.c.l.bf16 %v3101_v6  ;;  %v3332_v10 = vunpack.c.h.bf16 %v3101_v6  ;;  %v3352_v16 = vld [vmem:[%s3318_s29 + $0x8] sm:$0x1]  ;;  %v510_v17 = vld [vmem:[%s3318_s29 + $0xc] sm:$0xff]   ;;  %v512_v18 = vld [vmem:[%s3318_s29 + $0x14] sm:$0x1] }
  0x15   : > { %v264_v14 = vunpack.c.l.bf16 %v3325_v5  ;;  %v265_v15 = vunpack.c.h.bf16 %v3325_v5  ;;  %v515_v22 = vld [vmem:[%s3318_s29 + $0x20] sm:$0x1]  ;;  %v563_v23 = vunpack.c.l.bf16 %v3352_v16  ;;  %v3379_v29 = vunpack.c.l.bf16 %v510_v17  ;;  %v1351_v53 = vld [vmem:[%s3318_s29] sm:$0xe]  ;;  %v1352_v58 = vld [vmem:[%s3318_s29 + $0xc] sm:$0xe] }
  0x16   : > { %4919 = vst [vmem:[#allocation2_spill] sm:$0xff] %v3330_v9  ;;  %4920 = vst [vmem:[#allocation3_spill] sm:$0xff] %v3332_v10  ;;  %v303_v19 = vmul.f32 %v2951_v7, %v3337_v11  ;;  %v304_v20 = vmul.f32 %v3328_v8, %v3337_v11  ;;  %v443_v21 = vmul.f32 %v3330_v9, %v3347_v13  ;;  %v3386_v31 = vunpack.c.h.bf16 %v510_v17  ;;  %v1353_v59 = vld [vmem:[%s3318_s29 + $0x18] sm:$0xe]  ;;  %v3235_v1 = vld [vmem:[%s4880_s3 + $0x30] sm:$0xff]  }
  0x17   : > { %3161 = vmatpush3.bf16.msra.mxu0 %v3231_v2  ;;  %3214 = vmatpush3.bf16.msra.mxu1 %v3231_v2  ;;  %v373_v26 = vmul.f32 %v3342_v12, %v264_v14  ;;  %v374_v27 = vmul.f32 %v3342_v12, %v265_v15  ;;  %v444_v28 = vmul.f32 %v3332_v10, %v3347_v13  ;;  %v3388_v32 = vunpack.c.l.bf16 %v512_v18 }
  0x18   : > { %3162 = vmatprep.subr.bf16.mxu0 %v3232_v3  ;;  %3207 = vmatprep.subr.bf16.mxu1 %v3232_v3  ;;  %4921 = vst [vmem:[#allocation4_spill] sm:$0xff] %v3379_v29  ;;  %4922 = vst [vmem:[#allocation5_spill] sm:$0xff] %v3386_v31  ;;  %v3390_v33 = vunpack.c.l.bf16 %v515_v22  ;;  %v620_v34 = vmul.f32 %v2951_v7, %v3366_v24  ;;  %v621_v37 = vmul.f32 %v3328_v8, %v3366_v24  ;;  %v3104_v7 = vld [vmem:[%s3318_s29 + $0x60] sm:$0xff]  }
  0x19   : > { %4923 = vst [vmem:[#allocation6_spill] sm:$0xff] %v3388_v32  ;;  %v405_v35 = vadd.f32 %v373_v26, %v303_v19  ;;  %v406_v36 = vadd.f32 %v374_v27, %v304_v20  ;;  %v622_v38 = vmul.f32 %v3366_v24, %v563_v23  ;;  %v866_v41 = vmul.f32 %v3384_v30, %v3379_v29 }
  0x1a   : > { %4924 = vst [vmem:[#allocation7_spill] sm:$0xff] %v3390_v33  ;;  %v717_v40 = vrot.slane %v620_v34, 1  ;;  %v867_v42 = vmul.f32 %v3384_v30, %v3386_v31  ;;  %v868_v43 = vmul.f32 %v3384_v30, %v3388_v32  ;;  %v718_v47 = vrot.slane %v621_v37, 1 }
  0x1b   : > { %3163 = vmatpush3.bf16.msra.mxu0 %v3232_v3  ;;  %3215 = vmatpush3.bf16.msra.mxu1 %v3232_v3  ;;  %v475_v45 = vadd.f32 %v443_v21, %v405_v35  ;;  %v476_v46 = vadd.f32 %v444_v28, %v406_v36  ;;  %v720_v48 = vrot.slane %v622_v38, 1  ;;  %v962_v49 = vrot.slane %v866_v41, 1  ;;  %v3439_v21 = vld [vmem:[%s4878_s1 + $0x6] ss:$0 sm:$0xff]  ;;  %v3449_v28 = vld [vmem:[%s4878_s1 + $0xa] ss:$0 sm:$0xff] }
  0x1c   : > { %3164 = vmatprep.subr.bf16.mxu0 %v3233_v25  ;;  %3208 = vmatprep.subr.bf16.mxu1 %v3233_v25  ;;  %v963_v50 = vrot.slane %v867_v42, 1  ;;  %v965_v51 = vrot.slane %v868_v43, 1  ;;  %v1111_v52 = vmul.f32 %v3330_v9, %v3401_v39  ;;  %v719_v54 = vsel %vm716_vm0, %v717_v40, %v718_v47 }
  0x1d   : > { %v721_v55 = vsel %vm716_vm0, %v718_v47, %v720_v48  ;;  %v1112_v56 = vmul.f32 %v3332_v10, %v3401_v39  ;;  %v1113_v57 = vmul.f32 %v3401_v39, %v3390_v33  ;;  %v829_v60 = vadd.f32 %v719_v54, %v475_v45 }
  0x1e   : > { %v830_v61 = vadd.f32 %v721_v55, %v476_v46  ;;  %v964_v62 = vsel %vm716_vm0, %v962_v49, %v963_v50  ;;  %v1207_v63 = vrot.slane %v1111_v52, 1  ;;  %v966_v2 = vsel %vm716_vm0, %v963_v50, %v965_v51  ;;  %v3105_v49 = vld [vmem:[%s3318_s29 + $0x78] sm:$0xff]  }
  0x1f   : > { %3165 = vmatpush3.bf16.msra.mxu0 %v3233_v25  ;;  %3216 = vmatpush3.bf16.msra.mxu1 %v3233_v25  ;;  %v1208_v3 = vrot.slane %v1112_v56, 1  ;;  %v1210_v4 = vrot.slane %v1113_v57, 1  ;;  %v1369_v6 = vunpack.c.l.bf16 %v1351_v53  ;;  %v1074_v17 = vadd.f32 %v964_v62, %v829_v60 }
  0x20   : > { %3166 = vmatprep.subr.bf16.mxu0 %v3234_v44  ;;  %3209 = vmatprep.subr.bf16.mxu1 %v3234_v44  ;;  %v1075_v18 = vadd.f32 %v966_v2, %v830_v61  ;;  %v1370_v19 = vunpack.c.l.bf16 %v1352_v58  ;;  %v3434_v20 = vunpack.c.l.bf16 %v1353_v59  ;;  %v1393_v27 = vmul.f32 %v3328_v8, %v3427_v0  ;;  %v3236_v8 = vld [vmem:[%s4880_s3 + $0x38] sm:$0xff]   ;;  %v244_v58 = vld [vmem:[%s3318_s29 + $0x6c] sm:$0xff]  }
  0x21   : > { %v1209_v22 = vsel %vm716_vm0, %v1207_v63, %v1208_v3  ;;  %v1211_v25 = vsel %vm716_vm0, %v1208_v3, %v1210_v4  ;;  %v1392_v26 = vmul.f32 %v3427_v0, %v1369_v6  ;;  %v1394_v36 = vmul.f32 %v3427_v0, %v563_v23  ;;  %v3488_v4 = vld [vmem:[%s4879_s2] ss:$0 sm:$0xff] }
  0x22   : > { %v1319_v34 = vadd.f32 %v1209_v22, %v1074_v17  ;;  %v1320_v35 = vadd.f32 %v1211_v25, %v1075_v18  ;;  %v3454_v37 = vunpack.c.l.bf16 %v3104_v7  ;;  %v3460_v38 = vmul.f32 %v3427_v0, %v1370_v19  ;;  %v534_v22 = vld [vmem:[%s3318_s29 + $0x6c] sm:$0xff]  }
  0x23   : > { %3167 = vmatpush3.bf16.msra.mxu0 %v3234_v44  ;;  %3217 = vmatpush3.bf16.msra.mxu1 %v3234_v44  ;;  %v1489_v40 = vrot.slane %v1392_v26, 2  ;;  %v1490_v41 = vrot.slane %v1393_v27, 2  ;;  %v1638_v42 = vmul.f32 %v3439_v21, %v1370_v19  ;;  %v1492_v43 = vrot.slane %v1394_v36, 2  ;;  %v533_v19 = vld [vmem:[%s3318_s29 + $0x68] sm:$0x1] }
  0x24   : > { %4925 = vst [vmem:[#allocation8_spill] sm:$0xff] %v3454_v37  ;;  %3168 = vmatprep.subr.bf16.mxu0 %v3235_v1  ;;  %3210 = vmatprep.subr.bf16.mxu1 %v3235_v1  ;;  %v1639_v16 = vmul.f32 %v3439_v21, %v3386_v31  ;;  %v1640_v23 = vmul.f32 %v3439_v21, %v3388_v32  ;;  %v1494_v46 = vrot.slane %v3460_v38, 2  ;;  %v3480_v61 = vunpack.c.h.bf16 %v3104_v7 }
  0x25   : > { %v1883_v44 = vmul.f32 %v3449_v28, %v3434_v20  ;;  %v1491_v45 = vsel %vm1488_vm1, %v1489_v40, %v1490_v41  ;;  %v1734_v47 = vrot.slane %v1638_v42, 2  ;;  %v1884_v48 = vmul.f32 %v3332_v10, %v3449_v28  ;;  %v539_v42 = vld [vmem:[%s3318_s29 + $0x80] sm:$0x1] }
  0x26   : > { %v1493_v50 = vsel %vm1488_vm1, %v1490_v41, %v1492_v43  ;;  %v1601_v51 = vadd.f32 %v1491_v45, %v1319_v34  ;;  %v1735_v52 = vrot.slane %v1639_v16, 2  ;;  %v1737_v53 = vrot.slane %v1640_v23, 2 }
  0x27   : > { %3169 = vmatpush3.bf16.msra.mxu0 %v3235_v1  ;;  %3218 = vmatpush3.bf16.msra.mxu1 %v3235_v1  ;;  %v1602_v54 = vadd.f32 %v1493_v50, %v1320_v35  ;;  %v1885_v55 = vmul.f32 %v3449_v28, %v3390_v33  ;;  %v1979_v56 = vrot.slane %v1883_v44, 2  ;;  %v1980_v57 = vrot.slane %v1884_v48, 2  ;;  %v536_v35 = vld [vmem:[%s3318_s29 + $0x74] sm:$0x1] }
  0x28   : > { %3170 = vmatprep.subr.bf16.mxu0 %v3236_v8  ;;  %3211 = vmatprep.subr.bf16.mxu1 %v3236_v8  ;;  %v1736_v59 = vsel %vm1488_vm1, %v1734_v47, %v1735_v52  ;;  %v1738_v60 = vsel %vm1488_vm1, %v1735_v52, %v1737_v53  ;;  %v3482_v62 = vunpack.c.l.bf16 %v3105_v49  ;;  %v3490_v6 = vunpack.c.h.bf16 %v3105_v49 }
  0x29   : > { %v1846_v63 = vadd.f32 %v1736_v59, %v1601_v51  ;;  %v1847_v1 = vadd.f32 %v1738_v60, %v1602_v54  ;;  %v1981_v2 = vsel %vm1488_vm1, %v1979_v56, %v1980_v57  ;;  %v1982_v3 = vrot.slane %v1885_v55, 2 }
  0x2a   : > { %4926 = vst [vmem:[#allocation9_spill] sm:$0xff] %v3482_v62  ;;  %4927 = vst [vmem:[#allocation10_spill] sm:$0xff] %v3490_v6  ;;  %v3492_v7 = vunpack.c.l.bf16 %v244_v58  ;;  %v3494_v17 = vunpack.c.h.bf16 %v244_v58  ;;  %v319_v18 = vmul.f32 %v3454_v37, %v3337_v11  ;;  %v320_v27 = vmul.f32 %v3480_v61, %v3337_v11 }
  0x2b   : > { %3171 = vmatpush3.bf16.msra.mxu0 %v3236_v8  ;;  %3219 = vmatpush3.bf16.msra.mxu1 %v3236_v8  ;;  %v1983_v25 = vsel %vm1488_vm1, %v1980_v57, %v1982_v3  ;;  %v2091_v26 = vadd.f32 %v1981_v2, %v1846_v63  ;;  %v459_v34 = vmul.f32 %v3482_v62, %v3347_v13  ;;  %v3514_v16 = vunpack.c.l.bf16 %v533_v19 }
  0x2c   : > { %v2092_v36 = vadd.f32 %v1983_v25, %v1847_v1  ;;  %v389_v8 = vmul.f32 %v3342_v12, %v3492_v7  ;;  %v390_v40 = vmul.f32 %v3342_v12, %v3494_v17  ;;  %v460_v41 = vmul.f32 %v3490_v6, %v3347_v13 }
  0x2d   : > { %v2130_v43 = vadd.f32 %v3488_v4, %v2091_v26  ;;  %v3516_v23 = vunpack.c.l.bf16 %v534_v22  ;;  %v3518_v44 = vunpack.c.h.bf16 %v534_v22  ;;  %v3521_v49 = vunpack.c.l.bf16 %v536_v35 }
  0x2e   : > { %v2131_v45 = vadd.f32 %v3488_v4, %v2092_v36  ;;  %v421_v47 = vadd.f32 %v389_v8, %v319_v18  ;;  %v422_v48 = vadd.f32 %v390_v40, %v320_v27  ;;  %v3523_v51 = vunpack.c.l.bf16 %v539_v42  ;;  %v1359_v27 = vld [vmem:[%s3318_s29 + $0x60] sm:$0xe]  ;;  %v1360_v40 = vld [vmem:[%s3318_s29 + $0x6c] sm:$0xe] }
  0x2f   : > { %4928 = vst [vmem:[#allocation11_spill] sm:$0xff] %v3516_v23  ;;  %4929 = vst [vmem:[#allocation12_spill] sm:$0xff] %v3518_v44  ;;  %v2162_v50 = vmax.f32 %v2130_v43, 0.0  ;;  %v644_v52 = vmul.f32 %v3454_v37, %v3366_v24  ;;  %v645_v53 = vmul.f32 %v3480_v61, %v3366_v24  ;;  %v646_v57 = vmul.f32 %v3366_v24, %v3514_v16 }
  0x30   : > { %4930 = vst [vmem:[#allocation13_spill] sm:$0xff] %v3521_v49  ;;  %4931 = vst [vmem:[#allocation14_spill] sm:$0xff] %v3523_v51  ;;  %v2163_v54 = vmax.f32 %v2131_v45, 0.0  ;;  %v491_v55 = vadd.f32 %v459_v34, %v421_v47  ;;  %v492_v56 = vadd.f32 %v460_v41, %v422_v48  ;;  %v890_v60 = vmul.f32 %v3384_v30, %v3516_v23  ;;  %v1361_v41 = vld [vmem:[%s3318_s29 + $0x78] sm:$0xe] }
  0x31   : > { %v757_v58 = vrot.slane %v644_v52, 1  ;;  %v758_v59 = vrot.slane %v645_v53, 1  ;;  %v891_v63 = vmul.f32 %v3384_v30, %v3518_v44  ;;  %v760_v2 = vrot.slane %v646_v57, 1 }
  0x32   : > { %v2194_v1 = vpack.c.bf16 %v2163_v54, %v2162_v50  ;;  %v892_v3 = vmul.f32 %v3384_v30, %v3521_v49  ;;  %v1135_v18 = vmul.f32 %v3482_v62, %v3401_v39  ;;  %v1002_v22 = vrot.slane %v890_v60, 1 }
  0x33   : > { %v759_v19 = vsel %vm716_vm0, %v757_v58, %v758_v59  ;;  %v1003_v25 = vrot.slane %v891_v63, 1  ;;  %v1136_v26 = vmul.f32 %v3490_v6, %v3401_v39  ;;  %v761_v34 = vsel %vm716_vm0, %v758_v59, %v760_v2 }
  0x34   : > { %3172 = vmatprep.mubr.bf16.mxu0 %v2194_v1  ;;  %v845_v35 = vadd.f32 %v759_v19, %v491_v55  ;;  %v1005_v36 = vrot.slane %v892_v3, 1  ;;  %v1137_v8 = vmul.f32 %v3401_v39, %v3523_v51  ;;  %v846_v42 = vadd.f32 %v761_v34, %v492_v56 }
  0x35   : > { %v1004_v43 = vsel %vm716_vm0, %v1002_v22, %v1003_v25  ;;  %v1247_v45 = vrot.slane %v1135_v18, 1  ;;  %v1248_v47 = vrot.slane %v1136_v26, 1  ;;  %v3550_v53 = vunpack.c.l.bf16 %v1359_v27 }
  0x36   : > { %v1006_v48 = vsel %vm716_vm0, %v1003_v25, %v1005_v36  ;;  %v1090_v50 = vadd.f32 %v1004_v43, %v845_v35  ;;  %v1250_v52 = vrot.slane %v1137_v8, 1  ;;  %v3553_v57 = vunpack.c.l.bf16 %v1360_v40  ;;  %v232_v8 = vld [vmem:[%s3318_s29 + $0x24] sm:$0xff]  }
  0x37   : > { %v1091_v54 = vadd.f32 %v1006_v48, %v846_v42  ;;  %v1249_v55 = vsel %vm716_vm0, %v1247_v45, %v1248_v47  ;;  %v3555_v58 = vunpack.c.l.bf16 %v1361_v41  ;;  %v1416_v60 = vmul.f32 %v3427_v0, %v3550_v53 }
  0x38   : > { %4932 = vst [vmem:[#allocation15_spill] sm:$0xff] %v3553_v57  ;;  %v1251_v59 = vsel %vm716_vm0, %v1248_v47, %v1250_v52  ;;  %v1335_v56 = vadd.f32 %v1249_v55, %v1090_v50  ;;  %v1417_v63 = vmul.f32 %v3480_v61, %v3427_v0  ;;  %v1418_v2 = vmul.f32 %v3427_v0, %v3514_v16 }
  0x39   : > { %v1336_v1 = vadd.f32 %v1251_v59, %v1091_v54  ;;  %v1662_v3 = vmul.f32 %v3439_v21, %v3553_v57  ;;  %v1663_v18 = vmul.f32 %v3439_v21, %v3518_v44  ;;  %v1529_v19 = vrot.slane %v1416_v60, 2 }
  0x3a   : > { %v1530_v22 = vrot.slane %v1417_v63, 2  ;;  %v1664_v25 = vmul.f32 %v3439_v21, %v3521_v49  ;;  %v1907_v26 = vmul.f32 %v3449_v28, %v3555_v58  ;;  %v1532_v27 = vrot.slane %v1418_v2, 2 }
  0x3b   : > { %v1774_v34 = vrot.slane %v1662_v3, 2  ;;  %v1775_v35 = vrot.slane %v1663_v18, 2  ;;  %v1908_v36 = vmul.f32 %v3490_v6, %v3449_v28  ;;  %v1909_v42 = vmul.f32 %v3449_v28, %v3523_v51 }
  0x3c   : > { %v1531_v40 = vsel %vm1488_vm1, %v1529_v19, %v1530_v22  ;;  %v1777_v41 = vrot.slane %v1664_v25, 2  ;;  %v2019_v43 = vrot.slane %v1907_v26, 2  ;;  %v1533_v45 = vsel %vm1488_vm1, %v1530_v22, %v1532_v27  ;;  %v518_v25 = vld [vmem:[%s3318_s29 + $0x2c] sm:$0x1] }
  0x3d   : > { %v1617_v47 = vadd.f32 %v1531_v40, %v1335_v56  ;;  %v1776_v48 = vsel %vm1488_vm1, %v1774_v34, %v1775_v35  ;;  %v2020_v50 = vrot.slane %v1908_v36, 2  ;;  %v1618_v52 = vadd.f32 %v1533_v45, %v1336_v1  ;;  %v516_v56 = vld [vmem:[%s3318_s29 + $0x24] sm:$0xff]  }
  0x3e   : > { %v1778_v54 = vsel %vm1488_vm1, %v1775_v35, %v1777_v41  ;;  %v2022_v55 = vrot.slane %v1909_v42, 2  ;;  %v3581_v59 = vunpack.c.l.bf16 %v232_v8  ;;  %v3584_v2 = vunpack.c.h.bf16 %v232_v8 }
  0x3f   : > { %v1862_v60 = vadd.f32 %v1776_v48, %v1617_v47  ;;  %v2021_v63 = vsel %vm1488_vm1, %v2019_v43, %v2020_v50  ;;  %v305_v3 = vmul.f32 %v3337_v11, %v264_v14  ;;  %v1863_v18 = vadd.f32 %v1778_v54, %v1618_v52 }
  0x40   : > { %v2023_v19 = vsel %vm1488_vm1, %v2020_v50, %v2022_v55  ;;  %v306_v1 = vmul.f32 %v3337_v11, %v265_v15  ;;  %v375_v22 = vmul.f32 %v3330_v9, %v3342_v12  ;;  %v376_v27 = vmul.f32 %v3332_v10, %v3342_v12 }
  0x41   : > { %v2107_v26 = vadd.f32 %v2021_v63, %v1862_v60  ;;  %v445_v34 = vmul.f32 %v3347_v13, %v3581_v59  ;;  %v446_v14 = vmul.f32 %v3347_v13, %v3584_v2  ;;  %v2108_v35 = vadd.f32 %v2023_v19, %v1863_v18 }
  0x42   : > { %v407_v36 = vadd.f32 %v375_v22, %v305_v3  ;;  %v3603_v8 = vunpack.c.l.bf16 %v516_v56  ;;  %v3605_v5 = vunpack.c.h.bf16 %v516_v56  ;;  %v408_v40 = vadd.f32 %v376_v27, %v306_v1 }
  0x43   : > { %v2146_v15 = vadd.f32 %v3488_v4, %v2107_v26  ;;  %v3608_v41 = vunpack.c.l.bf16 %v518_v25  ;;  %v623_v42 = vmul.f32 %v3366_v24, %v3379_v29  ;;  %v2147_v43 = vadd.f32 %v3488_v4, %v2108_v35  ;;  %v1354_v25 = vld [vmem:[%s3318_s29 + $0x24] sm:$0xe] }
  0x44   : > { %4933 = vst [vmem:[#allocation16_spill] sm:$0xff] %v3603_v8  ;;  %4934 = vst [vmem:[#allocation17_spill] sm:$0xff] %v3605_v5  ;;  %v477_v45 = vadd.f32 %v445_v34, %v407_v36  ;;  %v624_v47 = vmul.f32 %v3366_v24, %v3386_v31  ;;  %v625_v48 = vmul.f32 %v3366_v24, %v3388_v32 }
  0x45   : > { %4935 = vst [vmem:[#allocation18_spill] sm:$0xff] %v3608_v41  ;;  %v2178_v50 = vmax.f32 %v2146_v15, 0.0  ;;  %v478_v52 = vadd.f32 %v446_v14, %v408_v40  ;;  %v722_v54 = vrot.slane %v623_v42, 1  ;;  %v869_v55 = vmul.f32 %v3330_v9, %v3384_v30 }
  0x46   : > { %v2179_v60 = vmax.f32 %v2147_v43, 0.0  ;;  %v723_v63 = vrot.slane %v624_v47, 1  ;;  %v725_v3 = vrot.slane %v625_v48, 1  ;;  %v870_v56 = vmul.f32 %v3332_v10, %v3384_v30 }
  0x47   : > { %v871_v18 = vmul.f32 %v3384_v30, %v3390_v33  ;;  %v967_v19 = vrot.slane %v869_v55, 1  ;;  %v1114_v1 = vmul.f32 %v3401_v39, %v3603_v8  ;;  %v1115_v22 = vmul.f32 %v3401_v39, %v3605_v5 }
  0x48   : > { %v2202_v26 = vpack.c.bf16 %v2179_v60, %v2178_v50  ;;  %v724_v27 = vsel %vm716_vm0, %v722_v54, %v723_v63  ;;  %v726_v34 = vsel %vm716_vm0, %v723_v63, %v725_v3  ;;  %v968_v14 = vrot.slane %v870_v56, 1 }
  0x49   : > { %v831_v35 = vadd.f32 %v724_v27, %v477_v45  ;;  %v832_v36 = vadd.f32 %v726_v34, %v478_v52  ;;  %v970_v15 = vrot.slane %v871_v18, 1  ;;  %v1116_v40 = vmul.f32 %v3401_v39, %v3608_v41 }
  0x4a   : > { %3188 = vmatprep.mubr.bf16.mxu1 %v2202_v26  ;;  %v969_v42 = vsel %vm716_vm0, %v967_v19, %v968_v14  ;;  %v1212_v43 = vrot.slane %v1114_v1, 1  ;;  %v1213_v47 = vrot.slane %v1115_v22, 1  ;;  %v3633_v48 = vunpack.c.l.bf16 %v1354_v25 }
  0x4b   : > { %v971_v50 = vsel %vm716_vm0, %v968_v14, %v970_v15  ;;  %v1076_v55 = vadd.f32 %v969_v42, %v831_v35  ;;  %v1215_v54 = vrot.slane %v1116_v40, 1  ;;  %v1396_v60 = vmul.f32 %v3427_v0, %v3386_v31  ;;  %v248_v15 = vld [vmem:[%s3318_s29 + $0x84] sm:$0xff]  }
  0x4c   : > { %v1077_v45 = vadd.f32 %v971_v50, %v832_v36  ;;  %v1214_v52 = vsel %vm716_vm0, %v1212_v43, %v1213_v47  ;;  %v1397_v63 = vmul.f32 %v3427_v0, %v3388_v32  ;;  %v1641_v3 = vmul.f32 %v3439_v21, %v3434_v20 }
  0x4d   : > { %v1216_v56 = vsel %vm716_vm0, %v1213_v47, %v1215_v54  ;;  %v1321_v18 = vadd.f32 %v1214_v52, %v1076_v55  ;;  %v1495_v19 = vrot.slane %v1396_v60, 2  ;;  %v1642_v1 = vmul.f32 %v3332_v10, %v3439_v21 }
  0x4e   : > { %v1322_v22 = vadd.f32 %v1216_v56, %v1077_v45  ;;  %v1497_v25 = vrot.slane %v1397_v63, 2  ;;  %v1643_v26 = vmul.f32 %v3439_v21, %v3390_v33  ;;  %v1739_v27 = vrot.slane %v1641_v3, 2 }
  0x4f   : > { %v1496_v34 = vsel %vm1488_vm1, %v1494_v46, %v1495_v19  ;;  %v1740_v14 = vrot.slane %v1642_v1, 2  ;;  %v1886_v35 = vmul.f32 %v3449_v28, %v3633_v48  ;;  %v1887_v36 = vmul.f32 %v3449_v28, %v3605_v5 }
  0x50   : > { %v1498_v40 = vsel %vm1488_vm1, %v1495_v19, %v1497_v25  ;;  %v1603_v42 = vadd.f32 %v1496_v34, %v1321_v18  ;;  %v1742_v43 = vrot.slane %v1643_v26, 2  ;;  %v1888_v47 = vmul.f32 %v3449_v28, %v3608_v41  ;;  %v540_v19 = vld [vmem:[%s3318_s29 + $0x84] sm:$0xff]  }
  0x51   : > { %v1604_v50 = vadd.f32 %v1498_v40, %v1322_v22  ;;  %v1741_v38 = vsel %vm1488_vm1, %v1739_v27, %v1740_v14  ;;  %v1984_v46 = vrot.slane %v1886_v35, 2  ;;  %v1985_v55 = vrot.slane %v1887_v36, 2  ;;  %v542_v27 = vld [vmem:[%s3318_s29 + $0x8c] sm:$0x1] }
  0x52   : > { %v1743_v54 = vsel %vm1488_vm1, %v1740_v14, %v1742_v43  ;;  %v1848_v60 = vadd.f32 %v1741_v38, %v1603_v42  ;;  %v1987_v45 = vrot.slane %v1888_v47, 2  ;;  %v3661_v52 = vunpack.c.l.bf16 %v248_v15 }
  0x53   : > { %v1849_v63 = vadd.f32 %v1743_v54, %v1604_v50  ;;  %v1986_v3 = vsel %vm1488_vm1, %v1984_v46, %v1985_v55  ;;  %v3664_v56 = vunpack.c.h.bf16 %v248_v15  ;;  %v321_v18 = vmul.f32 %v3337_v11, %v3492_v7 }
  0x54   : > { %v1988_v1 = vsel %vm1488_vm1, %v1985_v55, %v1987_v45  ;;  %v2093_v22 = vadd.f32 %v1986_v3, %v1848_v60  ;;  %v322_v25 = vmul.f32 %v3337_v11, %v3494_v17  ;;  %v391_v26 = vmul.f32 %v3482_v62, %v3342_v12 }
  0x55   : > { %v2094_v34 = vadd.f32 %v1988_v1, %v1849_v63  ;;  %v392_v14 = vmul.f32 %v3490_v6, %v3342_v12  ;;  %v461_v35 = vmul.f32 %v3347_v13, %v3661_v52  ;;  %v462_v36 = vmul.f32 %v3347_v13, %v3664_v56 }
  0x56   : > { %v2132_v15 = vadd.f32 %v3488_v4, %v2093_v22  ;;  %v423_v40 = vadd.f32 %v391_v26, %v321_v18  ;;  %v3682_v42 = vunpack.c.l.bf16 %v540_v19  ;;  %v3684_v43 = vunpack.c.h.bf16 %v540_v19 }
  0x57   : > { %v2133_v47 = vadd.f32 %v3488_v4, %v2094_v34  ;;  %v424_v50 = vadd.f32 %v392_v14, %v322_v25  ;;  %v3687_v38 = vunpack.c.l.bf16 %v542_v27  ;;  %v647_v46 = vmul.f32 %v3366_v24, %v3516_v23 }
  0x58   : > { %4936 = vst [vmem:[#allocation19_spill] sm:$0xff] %v3682_v42  ;;  %4937 = vst [vmem:[#allocation20_spill] sm:$0xff] %v3684_v43  ;;  %v2164_v55 = vmax.f32 %v2132_v15, 0.0  ;;  %v493_v54 = vadd.f32 %v461_v35, %v423_v40  ;;  %v648_v60 = vmul.f32 %v3366_v24, %v3518_v44  ;;  %v649_v45 = vmul.f32 %v3366_v24, %v3521_v49 }
  0x59   : > { %4938 = vst [vmem:[#allocation21_spill] sm:$0xff] %v3687_v38  ;;  %v2165_v63 = vmax.f32 %v2133_v47, 0.0  ;;  %v494_v3 = vadd.f32 %v462_v36, %v424_v50  ;;  %v762_v18 = vrot.slane %v647_v46, 1  ;;  %v893_v19 = vmul.f32 %v3482_v62, %v3384_v30  ;;  %v1362_v36 = vld [vmem:[%s3318_s29 + $0x84] sm:$0xe] }
  0x5a   : > { %v763_v1 = vrot.slane %v648_v60, 1  ;;  %v765_v22 = vrot.slane %v649_v45, 1  ;;  %v894_v25 = vmul.f32 %v3490_v6, %v3384_v30  ;;  %v895_v26 = vmul.f32 %v3384_v30, %v3523_v51 }
  0x5b   : > { %v2195_v27 = vpack.c.bf16 %v2165_v63, %v2164_v55  ;;  %v1007_v34 = vrot.slane %v893_v19, 1  ;;  %v1138_v14 = vmul.f32 %v3401_v39, %v3682_v42  ;;  %v1139_v35 = vmul.f32 %v3401_v39, %v3684_v43 }
  0x5c   : > { %v764_v15 = vsel %vm716_vm0, %v762_v18, %v763_v1  ;;  %v766_v40 = vsel %vm716_vm0, %v763_v1, %v765_v22  ;;  %v1008_v47 = vrot.slane %v894_v25, 1  ;;  %v1010_v50 = vrot.slane %v895_v26, 1 }
  0x5d   : > { %3173 = vmatmul.mubr.bf16.vlgmr.msra.gmra.mrb[0].mxu0 %v2195_v27  ;;  %v847_v46 = vadd.f32 %v764_v15, %v493_v54  ;;  %v848_v60 = vadd.f32 %v766_v40, %v494_v3  ;;  %v1140_v55 = vmul.f32 %v3401_v39, %v3687_v38  ;;  %v1252_v45 = vrot.slane %v1138_v14, 1 }
  0x5e   : > { %v1009_v63 = vsel %vm716_vm0, %v1007_v34, %v1008_v47  ;;  %v1011_v19 = vsel %vm716_vm0, %v1008_v47, %v1010_v50  ;;  %v1253_v32 = vrot.slane %v1139_v35, 1  ;;  %v3712_v31 = vunpack.c.l.bf16 %v1362_v36 }
  0x5f   : > { %v1092_v29 = vadd.f32 %v1009_v63, %v847_v46  ;;  %v1093_v18 = vadd.f32 %v1011_v19, %v848_v60  ;;  %v1255_v23 = vrot.slane %v1140_v55, 1  ;;  %v1419_v1 = vmul.f32 %v3427_v0, %v3553_v57 }
  0x60   : > { %v1254_v54 = vsel %vm716_vm0, %v1252_v45, %v1253_v32  ;;  %v1420_v3 = vmul.f32 %v3427_v0, %v3518_v44  ;;  %v1421_v22 = vmul.f32 %v3427_v0, %v3521_v49  ;;  %v1665_v25 = vmul.f32 %v3439_v21, %v3555_v58 }
  0x61   : > { %v1256_v26 = vsel %vm716_vm0, %v1253_v32, %v1255_v23  ;;  %v1337_v27 = vadd.f32 %v1254_v54, %v1092_v29  ;;  %v1534_v34 = vrot.slane %v1419_v1, 2  ;;  %v1666_v14 = vmul.f32 %v3490_v6, %v3439_v21  ;;  %v3102_v32 = vld [vmem:[%s3318_s29 + $0x30] sm:$0xff]  }
  0x62   : > { %v1338_v35 = vadd.f32 %v1256_v26, %v1093_v18  ;;  %v1535_v36 = vrot.slane %v1420_v3, 2  ;;  %v1537_v15 = vrot.slane %v1421_v22, 2  ;;  %v1667_v40 = vmul.f32 %v3439_v21, %v3523_v51 }
  0x63   : > { %v1779_v47 = vrot.slane %v1665_v25, 2  ;;  %v1780_v50 = vrot.slane %v1666_v14, 2  ;;  %v1910_v46 = vmul.f32 %v3449_v28, %v3712_v31  ;;  %v1911_v60 = vmul.f32 %v3449_v28, %v3684_v43 }
  0x64   : > { %v1536_v29 = vsel %vm1488_vm1, %v1534_v34, %v1535_v36  ;;  %v1538_v23 = vsel %vm1488_vm1, %v1535_v36, %v1537_v15  ;;  %v1782_v55 = vrot.slane %v1667_v40, 2  ;;  %v1912_v45 = vmul.f32 %v3449_v28, %v3687_v38  ;;  %v521_v15 = vld [vmem:[%s3318_s29 + $0x38] sm:$0x1] }
  0x65   : > { %v1619_v63 = vadd.f32 %v1536_v29, %v1337_v27  ;;  %v1620_v19 = vadd.f32 %v1538_v23, %v1338_v35  ;;  %v1781_v18 = vsel %vm1488_vm1, %v1779_v47, %v1780_v50  ;;  %v2024_v1 = vrot.slane %v1910_v46, 2 }
  0x66   : > { %v1783_v54 = vsel %vm1488_vm1, %v1780_v50, %v1782_v55  ;;  %v2025_v3 = vrot.slane %v1911_v60, 2  ;;  %v2027_v22 = vrot.slane %v1912_v45, 2  ;;  %v3739_v25 = vunpack.c.l.bf16 %v3102_v32 }
  0x67   : > { %v1864_v26 = vadd.f32 %v1781_v18, %v1619_v63  ;;  %v1865_v34 = vadd.f32 %v1783_v54, %v1620_v19  ;;  %v3741_v14 = vunpack.c.h.bf16 %v3102_v32  ;;  %v307_v36 = vmul.f32 %v3330_v9, %v3337_v11 }
  0x68   : > { %4939 = vst [vmem:[#allocation22_spill] sm:$0xff] %v3739_v25  ;;  %v2026_v27 = vsel %vm1488_vm1, %v2024_v1, %v2025_v3  ;;  %v2028_v35 = vsel %vm1488_vm1, %v2025_v3, %v2027_v22  ;;  %v308_v40 = vmul.f32 %v3332_v10, %v3337_v11  ;;  %v377_v47 = vmul.f32 %v3342_v12, %v3581_v59 }
  0x69   : > { %4940 = vst [vmem:[#allocation23_spill] sm:$0xff] %v3741_v14  ;;  %v2109_v50 = vadd.f32 %v2026_v27, %v1864_v26  ;;  %v2110_v46 = vadd.f32 %v2028_v35, %v1865_v34  ;;  %v378_v60 = vmul.f32 %v3342_v12, %v3584_v2  ;;  %v447_v32 = vmul.f32 %v3739_v25, %v3347_v13 }
  0x6a   : > { %v409_v29 = vadd.f32 %v377_v47, %v307_v36  ;;  %v448_v23 = vmul.f32 %v3741_v14, %v3347_v13  ;;  %v3758_v55 = vunpack.c.l.bf16 %v521_v15  ;;  %v626_v45 = vmul.f32 %v3330_v9, %v3366_v24 }
  0x6b   : > { %v2148_v63 = vadd.f32 %v3488_v4, %v2109_v50  ;;  %v2149_v19 = vadd.f32 %v3488_v4, %v2110_v46  ;;  %v410_v18 = vadd.f32 %v378_v60, %v308_v40  ;;  %v627_v1 = vmul.f32 %v3332_v10, %v3366_v24 }
  0x6c   : > { %4941 = vst [vmem:[#allocation24_spill] sm:$0xff] %v3758_v55  ;;  %v479_v54 = vadd.f32 %v447_v32, %v409_v29  ;;  %v628_v3 = vmul.f32 %v3366_v24, %v3390_v33  ;;  %v727_v22 = vrot.slane %v626_v45, 1  ;;  %v872_v26 = vmul.f32 %v3384_v30, %v3603_v8  ;;  %v1355_v45 = vld [vmem:[%s3318_s29 + $0x30] sm:$0xe] }
  0x6d   : > { %v2180_v34 = vmax.f32 %v2148_v63, 0.0  ;;  %v2181_v36 = vmax.f32 %v2149_v19, 0.0  ;;  %v480_v15 = vadd.f32 %v448_v23, %v410_v18  ;;  %v728_v27 = vrot.slane %v627_v1, 1 }
  0x6e   : > { %v730_v35 = vrot.slane %v628_v3, 1  ;;  %v873_v40 = vmul.f32 %v3384_v30, %v3605_v5  ;;  %v874_v47 = vmul.f32 %v3384_v30, %v3608_v41  ;;  %v972_v50 = vrot.slane %v872_v26, 1 }
  0x6f   : > { %v2203_v46 = vpack.c.bf16 %v2181_v36, %v2180_v34  ;;  %v729_v60 = vsel %vm716_vm0, %v727_v22, %v728_v27  ;;  %v1117_v32 = vmul.f32 %v3739_v25, %v3401_v39  ;;  %v1118_v29 = vmul.f32 %v3741_v14, %v3401_v39 }
  0x70   : > { %v731_v23 = vsel %vm716_vm0, %v728_v27, %v730_v35  ;;  %v833_v63 = vadd.f32 %v729_v60, %v479_v54  ;;  %v973_v19 = vrot.slane %v873_v40, 1  ;;  %v975_v18 = vrot.slane %v874_v47, 1 }
  0x71   : > { %3189 = vmatmul.mubr.bf16.vlgmr.msra.gmra.mrb[0].mxu1 %v2203_v46  ;;  %v834_v1 = vadd.f32 %v731_v23, %v480_v15  ;;  %v1119_v3 = vmul.f32 %v3401_v39, %v3758_v55  ;;  %v1217_v26 = vrot.slane %v1117_v32, 1  ;;  %v1218_v34 = vrot.slane %v1118_v29, 1  ;;  %v3106_v23 = vld [vmem:[%s3318_s29 + $0x90] sm:$0xff]  }
  0x72   : > { %v974_v22 = vsel %vm716_vm0, %v972_v50, %v973_v19  ;;  %v976_v36 = vsel %vm716_vm0, %v973_v19, %v975_v18  ;;  %v3785_v9 = vunpack.c.l.bf16 %v1355_v45  ;;  %v1398_v27 = vmul.f32 %v3427_v0, %v3434_v20 }
  0x73   : > { %v1078_v54 = vadd.f32 %v974_v22, %v833_v63  ;;  %v1079_v35 = vadd.f32 %v976_v36, %v834_v1  ;;  %v1219_v40 = vsel %vm716_vm0, %v1217_v26, %v1218_v34  ;;  %v1220_v15 = vrot.slane %v1119_v3, 1 }
  0x74   : > { %v1399_v47 = vmul.f32 %v3332_v10, %v3427_v0  ;;  %v1400_v46 = vmul.f32 %v3427_v0, %v3390_v33  ;;  %v1499_v50 = vrot.slane %v1398_v27, 2  ;;  %v1644_v60 = vmul.f32 %v3439_v21, %v3633_v48  ;;  %v545_v10 = vld [vmem:[%s3318_s29 + $0x98] sm:$0x1] }
  0x75   : > { %v1221_v32 = vsel %vm716_vm0, %v1218_v34, %v1220_v15  ;;  %v1323_v29 = vadd.f32 %v1219_v40, %v1078_v54  ;;  %v1645_v20 = vmul.f32 %v3439_v21, %v3605_v5  ;;  %v1646_v45 = vmul.f32 %v3439_v21, %v3608_v41 }
  0x76   : > { %v1324_v63 = vadd.f32 %v1221_v32, %v1079_v35  ;;  %v1500_v19 = vrot.slane %v1399_v47, 2  ;;  %v1502_v18 = vrot.slane %v1400_v46, 2  ;;  %v1744_v1 = vrot.slane %v1644_v60, 2 }
  0x77   : > { %v1745_v3 = vrot.slane %v1645_v20, 2  ;;  %v1747_v26 = vrot.slane %v1646_v45, 2  ;;  %v1889_v22 = vmul.f32 %v3449_v28, %v3785_v9  ;;  %v1890_v34 = vmul.f32 %v3741_v14, %v3449_v28 }
  0x78   : > { %v1501_v36 = vsel %vm1488_vm1, %v1499_v50, %v1500_v19  ;;  %v1503_v27 = vsel %vm1488_vm1, %v1500_v19, %v1502_v18  ;;  %v1891_v54 = vmul.f32 %v3449_v28, %v3758_v55  ;;  %v3810_v35 = vunpack.c.l.bf16 %v3106_v23 }
  0x79   : > { %v1605_v40 = vadd.f32 %v1501_v36, %v1323_v29  ;;  %v1606_v15 = vadd.f32 %v1503_v27, %v1324_v63  ;;  %v1746_v47 = vsel %vm1488_vm1, %v1744_v1, %v1745_v3  ;;  %v1748_v46 = vsel %vm1488_vm1, %v1745_v3, %v1747_v26 }
  0x7a   : > { %4942 = vst [vmem:[#allocation25_spill] sm:$0xff] %v3810_v35  ;;  %v1989_v60 = vrot.slane %v1889_v22, 2  ;;  %v1990_v32 = vrot.slane %v1890_v34, 2  ;;  %v1992_v20 = vrot.slane %v1891_v54, 2  ;;  %v3814_v45 = vunpack.c.h.bf16 %v3106_v23 }
  0x7b   : > { %v1850_v50 = vadd.f32 %v1746_v47, %v1605_v40  ;;  %v1851_v33 = vadd.f32 %v1748_v46, %v1606_v15  ;;  %v323_v19 = vmul.f32 %v3482_v62, %v3337_v11  ;;  %v324_v18 = vmul.f32 %v3490_v6, %v3337_v11 }
  0x7c   : > { %4943 = vst [vmem:[#allocation26_spill] sm:$0xff] %v3814_v45  ;;  %v1991_v29 = vsel %vm1488_vm1, %v1989_v60, %v1990_v32  ;;  %v1993_v63 = vsel %vm1488_vm1, %v1990_v32, %v1992_v20  ;;  %v393_v1 = vmul.f32 %v3342_v12, %v3661_v52  ;;  %v394_v23 = vmul.f32 %v3342_v12, %v3664_v56 }
  0x7d   : > { %v2095_v3 = vadd.f32 %v1991_v29, %v1850_v50  ;;  %v2096_v26 = vadd.f32 %v1993_v63, %v1851_v33  ;;  %v463_v22 = vmul.f32 %v3810_v35, %v3347_v13  ;;  %v464_v34 = vmul.f32 %v3814_v45, %v3347_v13  ;;  %v1363_v63 = vld [vmem:[%s3318_s29 + $0x90] sm:$0xe] }
  0x7e   : > { %v425_v11 = vadd.f32 %v393_v1, %v323_v19  ;;  %v426_v36 = vadd.f32 %v394_v23, %v324_v18  ;;  %v3831_v27 = vunpack.c.l.bf16 %v545_v10  ;;  %v650_v54 = vmul.f32 %v3482_v62, %v3366_v24 }
  0x7f   : > { %v2134_v40 = vadd.f32 %v3488_v4, %v2095_v3  ;;  %v2135_v12 = vadd.f32 %v3488_v4, %v2096_v26  ;;  %v651_v33 = vmul.f32 %v3490_v6, %v3366_v24  ;;  %v652_v15 = vmul.f32 %v3366_v24, %v3523_v51 }
  0x80   : > { %4944 = vst [vmem:[#allocation27_spill] sm:$0xff] %v3831_v27  ;;  %v495_v47 = vadd.f32 %v463_v22, %v425_v11  ;;  %v496_v13 = vadd.f32 %v464_v34, %v426_v36  ;;  %v767_v46 = vrot.slane %v650_v54, 1  ;;  %v896_v10 = vmul.f32 %v3384_v30, %v3682_v42 }
  0x81   : > { %v2166_v60 = vmax.f32 %v2134_v40, 0.0  ;;  %v2167_v32 = vmax.f32 %v2135_v12, 0.0  ;;  %v768_v20 = vrot.slane %v651_v33, 1  ;;  %v770_v50 = vrot.slane %v652_v15, 1 }
  0x82   : > { %v897_v19 = vmul.f32 %v3384_v30, %v3684_v43  ;;  %v898_v18 = vmul.f32 %v3384_v30, %v3687_v38  ;;  %v1012_v29 = vrot.slane %v896_v10, 1  ;;  %v1141_v24 = vmul.f32 %v3810_v35, %v3401_v39 }
  0x83   : > { %v2196_v1 = vpack.c.bf16 %v2167_v32, %v2166_v60  ;;  %v769_v23 = vsel %vm716_vm0, %v767_v46, %v768_v20  ;;  %v771_v3 = vsel %vm716_vm0, %v768_v20, %v770_v50  ;;  %v1142_v26 = vmul.f32 %v3814_v45, %v3401_v39 }
  0x84   : > { %v849_v22 = vadd.f32 %v769_v23, %v495_v47  ;;  %v850_v34 = vadd.f32 %v771_v3, %v496_v13  ;;  %v1013_v11 = vrot.slane %v897_v19, 1  ;;  %v1015_v36 = vrot.slane %v898_v18, 1 }
  0x85   : > { %3176 = vmatprep.mubr.bf16.mxu0 %v2196_v1  ;;  %v1143_v30 = vmul.f32 %v3401_v39, %v3831_v27  ;;  %v1257_v54 = vrot.slane %v1141_v24, 1  ;;  %v1258_v40 = vrot.slane %v1142_v26, 1  ;;  %v3856_v12 = vunpack.c.l.bf16 %v1363_v63  ;;  %v236_v63 = vld [vmem:[%s3318_s29 + $0x3c] sm:$0xff]  }
  0x86   : > { %v1014_v33 = vsel %vm716_vm0, %v1012_v29, %v1013_v11  ;;  %v1016_v15 = vsel %vm716_vm0, %v1013_v11, %v1015_v36  ;;  %v1422_v46 = vmul.f32 %v3427_v0, %v3555_v58  ;;  %v1423_v47 = vmul.f32 %v3490_v6, %v3427_v0 }
  0x87   : > { %v1094_v13 = vadd.f32 %v1014_v33, %v849_v22  ;;  %v1095_v10 = vadd.f32 %v1016_v15, %v850_v34  ;;  %v1259_v60 = vsel %vm716_vm0, %v1257_v54, %v1258_v40  ;;  %v1260_v39 = vrot.slane %v1143_v30, 1 }
  0x88   : > { %v1424_v32 = vmul.f32 %v3427_v0, %v3523_v51  ;;  %v1539_v20 = vrot.slane %v1422_v46, 2  ;;  %v1540_v50 = vrot.slane %v1423_v47, 2  ;;  %v1668_v19 = vmul.f32 %v3439_v21, %v3712_v31 }
  0x89   : > { %v1261_v18 = vsel %vm716_vm0, %v1258_v40, %v1260_v39  ;;  %v1339_v29 = vadd.f32 %v1259_v60, %v1094_v13  ;;  %v1669_v58 = vmul.f32 %v3439_v21, %v3684_v43  ;;  %v1670_v24 = vmul.f32 %v3439_v21, %v3687_v38 }
  0x8a   : > { %v1340_v1 = vadd.f32 %v1261_v18, %v1095_v10  ;;  %v1541_v23 = vsel %vm1488_vm1, %v1539_v20, %v1540_v50  ;;  %v1542_v3 = vrot.slane %v1424_v32, 2  ;;  %v1784_v0 = vrot.slane %v1668_v19, 2  ;;  %v522_v18 = vld [vmem:[%s3318_s29 + $0x3c] sm:$0xff]  }
  0x8b   : > { %v1621_v26 = vadd.f32 %v1541_v23, %v1339_v29  ;;  %v1785_v22 = vrot.slane %v1669_v58, 2  ;;  %v1787_v34 = vrot.slane %v1670_v24, 2  ;;  %v1913_v11 = vmul.f32 %v3449_v28, %v3856_v12  ;;  %v524_v29 = vld [vmem:[%s3318_s29 + $0x44] sm:$0x1] }
  0x8c   : > { %v1543_v36 = vsel %vm1488_vm1, %v1540_v50, %v1542_v3  ;;  %v1914_v30 = vmul.f32 %v3814_v45, %v3449_v28  ;;  %v1915_v21 = vmul.f32 %v3449_v28, %v3831_v27  ;;  %v3883_v54 = vunpack.c.l.bf16 %v236_v63  ;;  %v3892_v28 = vld [vmem:[%s4878_s1] ss:$0 sm:$0xff]  ;;  %v3901_v50 = vld [vmem:[%s4878_s1 + $0x4] ss:$0 sm:$0xff] }
  0x8d   : > { %v1622_v40 = vadd.f32 %v1543_v36, %v1340_v1  ;;  %v1786_v33 = vsel %vm1488_vm1, %v1784_v0, %v1785_v22  ;;  %v1788_v15 = vsel %vm1488_vm1, %v1785_v22, %v1787_v34  ;;  %v2029_v46 = vrot.slane %v1913_v11, 2 }
  0x8e   : > { %v1866_v47 = vadd.f32 %v1786_v33, %v1621_v26  ;;  %v2030_v13 = vrot.slane %v1914_v30, 2  ;;  %v2032_v10 = vrot.slane %v1915_v21, 2  ;;  %v3887_v60 = vunpack.c.h.bf16 %v236_v63 }
  0x8f   : > { %v1867_v39 = vadd.f32 %v1788_v15, %v1622_v40  ;;  %v309_v32 = vmul.f32 %v3892_v28, %v3581_v59  ;;  %v310_v20 = vmul.f32 %v3892_v28, %v3584_v2  ;;  %v379_v19 = vmul.f32 %v3901_v50, %v3739_v25  ;;  %v3914_v2 = vld [vmem:[%s4878_s1 + $0x8] ss:$0 sm:$0xff]  ;;  %v3931_v40 = vld [vmem:[%s4878_s1 + $0x1] ss:$0 sm:$0xff] }
  0x90   : > { %v2031_v58 = vsel %vm1488_vm1, %v2029_v46, %v2030_v13  ;;  %v2033_v24 = vsel %vm1488_vm1, %v2030_v13, %v2032_v10  ;;  %v380_v59 = vmul.f32 %v3901_v50, %v3741_v14  ;;  %v449_v63 = vmul.f32 %v3914_v2, %v3883_v54 }
  0x91   : > { %v2111_v1 = vadd.f32 %v2031_v58, %v1866_v47  ;;  %v2112_v23 = vadd.f32 %v2033_v24, %v1867_v39  ;;  %v411_v3 = vadd.f32 %v379_v19, %v309_v32  ;;  %v450_v0 = vmul.f32 %v3914_v2, %v3887_v60 }
  0x92   : > { %v412_v26 = vadd.f32 %v380_v59, %v310_v20  ;;  %v3920_v22 = vunpack.c.l.bf16 %v522_v18  ;;  %v3922_v34 = vunpack.c.h.bf16 %v522_v18  ;;  %v3924_v11 = vunpack.c.l.bf16 %v524_v29 }
  0x93   : > { %v2150_v36 = vadd.f32 %v3488_v4, %v2111_v1  ;;  %v2151_v30 = vadd.f32 %v3488_v4, %v2112_v23  ;;  %v481_v21 = vadd.f32 %v449_v63, %v411_v3  ;;  %v629_v33 = vmul.f32 %v3931_v40, %v3603_v8  ;;  %v3942_v4 = vld [vmem:[%s4878_s1 + $0x5] ss:$0 sm:$0xff]  ;;  %v3953_v63 = vld [vmem:[%s4878_s1 + $0x9] ss:$0 sm:$0xff]  ;;  %v1356_v3 = vld [vmem:[%s3318_s29 + $0x3c] sm:$0xe] }
  0x94   : > { %4945 = vst [vmem:[#allocation28_spill] sm:$0xff] %v3920_v22  ;;  %4946 = vst [vmem:[#allocation29_spill] sm:$0xff] %v3922_v34  ;;  %v482_v15 = vadd.f32 %v450_v0, %v412_v26  ;;  %v630_v46 = vmul.f32 %v3931_v40, %v3605_v5  ;;  %v631_v47 = vmul.f32 %v3931_v40, %v3608_v41  ;;  %v3966_v8 = vunpack.c.l.bf16 %v1356_v3 }
  0x95   : > { %4947 = vst [vmem:[#allocation30_spill] sm:$0xff] %v3924_v11  ;;  %v875_v13 = vmul.f32 %v3942_v4, %v3739_v25  ;;  %v2182_v10 = vmax.f32 %v2150_v36, 0.0  ;;  %v2183_v39 = vmax.f32 %v2151_v30, 0.0  ;;  %v732_v32 = vrot.slane %v629_v33, 1 }
  0x96   : > { %v876_v20 = vmul.f32 %v3942_v4, %v3741_v14  ;;  %v733_v19 = vrot.slane %v630_v46, 1  ;;  %v735_v18 = vrot.slane %v631_v47, 1  ;;  %v877_v29 = vmul.f32 %v3942_v4, %v3758_v55 }
  0x97   : > { %v977_v58 = vrot.slane %v875_v13, 1  ;;  %v2204_v24 = vpack.c.bf16 %v2183_v39, %v2182_v10  ;;  %v1120_v1 = vmul.f32 %v3953_v63, %v3920_v22  ;;  %v1121_v23 = vmul.f32 %v3953_v63, %v3922_v34 }
  0x98   : > { %v978_v59 = vrot.slane %v876_v20, 1  ;;  %v734_v0 = vsel %vm716_vm0, %v732_v32, %v733_v19  ;;  %v736_v26 = vsel %vm716_vm0, %v733_v19, %v735_v18  ;;  %v980_v36 = vrot.slane %v877_v29, 1  ;;  %v3971_v19 = vld [vmem:[%s4878_s1 + $0x2] ss:$0 sm:$0xff] }
  0x99   : > { %v1122_v30 = vmul.f32 %v3953_v63, %v3924_v11  ;;  %3192 = vmatprep.mubr.bf16.mxu1 %v2204_v24  ;;  %v835_v33 = vadd.f32 %v734_v0, %v481_v21  ;;  %v836_v46 = vadd.f32 %v736_v26, %v482_v15  ;;  %v1222_v13 = vrot.slane %v1120_v1, 1  ;;  %v3984_v24 = vld [vmem:[%s4878_s1 + $0x6] ss:$0 sm:$0xff] }
  0x9a   : > { %v979_v47 = vsel %vm716_vm0, %v977_v58, %v978_v59  ;;  %v981_v10 = vsel %vm716_vm0, %v978_v59, %v980_v36  ;;  %v1223_v39 = vrot.slane %v1121_v23, 1  ;;  %v1401_v21 = vmul.f32 %v3971_v19, %v3633_v48 }
  0x9b   : > { %v1225_v20 = vrot.slane %v1122_v30, 1  ;;  %v1080_v51 = vadd.f32 %v979_v47, %v835_v33  ;;  %v1081_v32 = vadd.f32 %v981_v10, %v836_v46  ;;  %v1402_v15 = vmul.f32 %v3971_v19, %v3605_v5  ;;  %v3996_v46 = vld [vmem:[%s4878_s1 + $0xa] ss:$0 sm:$0xff]  ;;  %v252_v10 = vld [vmem:[%s3318_s29 + $0x9c] sm:$0xff]  }
  0x9c   : > { %v1224_v18 = vsel %vm716_vm0, %v1222_v13, %v1223_v39  ;;  %v1403_v58 = vmul.f32 %v3971_v19, %v3608_v41  ;;  %v1647_v59 = vmul.f32 %v3984_v24, %v3785_v9  ;;  %v1504_v23 = vrot.slane %v1401_v21, 2 }
  0x9d   : > { %v1226_v29 = vsel %vm716_vm0, %v1223_v39, %v1225_v20  ;;  %v1325_v48 = vadd.f32 %v1224_v18, %v1080_v51  ;;  %v1505_v3 = vrot.slane %v1402_v15, 2  ;;  %v1648_v26 = vmul.f32 %v3984_v24, %v3741_v14 }
  0x9e   : > { %v1326_v1 = vadd.f32 %v1226_v29, %v1081_v32  ;;  %v1507_v0 = vrot.slane %v1403_v58, 2  ;;  %v1649_v36 = vmul.f32 %v3984_v24, %v3758_v55  ;;  %v1749_v30 = vrot.slane %v1647_v59, 2 }
  0x9f   : > { %v1506_v33 = vsel %vm1488_vm1, %v1504_v23, %v1505_v3  ;;  %v1892_v51 = vmul.f32 %v3996_v46, %v3966_v8  ;;  %v1893_v47 = vmul.f32 %v3996_v46, %v3922_v34  ;;  %v1894_v13 = vmul.f32 %v3996_v46, %v3924_v11 }
  0xa0   : > { %v1508_v39 = vsel %vm1488_vm1, %v1505_v3, %v1507_v0  ;;  %v1607_v20 = vadd.f32 %v1506_v33, %v1325_v48  ;;  %v1750_v32 = vrot.slane %v1648_v26, 2  ;;  %v1752_v21 = vrot.slane %v1649_v36, 2  ;;  %v546_v0 = vld [vmem:[%s3318_s29 + $0x9c] sm:$0xff]   ;;  %v548_v33 = vld [vmem:[%s3318_s29 + $0xa4] sm:$0x1] }
  0xa1   : > { %v1608_v15 = vadd.f32 %v1508_v39, %v1326_v1  ;;  %v1994_v18 = vrot.slane %v1892_v51, 2  ;;  %v1995_v29 = vrot.slane %v1893_v47, 2  ;;  %v1997_v58 = vrot.slane %v1894_v13, 2 }
  0xa2   : > { %v1751_v59 = vsel %vm1488_vm1, %v1749_v30, %v1750_v32  ;;  %v1753_v23 = vsel %vm1488_vm1, %v1750_v32, %v1752_v21  ;;  %v4008_v41 = vunpack.c.l.bf16 %v252_v10  ;;  %v4010_v5 = vunpack.c.h.bf16 %v252_v10  ;;  %v4035_v32 = vld [vmem:[%s4879_s2] ss:$0 sm:$0xff] }
  0xa3   : > { %v1852_v6 = vadd.f32 %v1751_v59, %v1607_v20  ;;  %v1853_v62 = vadd.f32 %v1753_v23, %v1608_v15  ;;  %v1996_v3 = vsel %vm1488_vm1, %v1994_v18, %v1995_v29  ;;  %v1998_v48 = vsel %vm1488_vm1, %v1995_v29, %v1997_v58 }
  0xa4   : > { %v325_v1 = vmul.f32 %v3892_v28, %v3661_v52  ;;  %v326_v26 = vmul.f32 %v3892_v28, %v3664_v56  ;;  %v395_v36 = vmul.f32 %v3901_v50, %v3810_v35  ;;  %v396_v30 = vmul.f32 %v3901_v50, %v3814_v45 }
  0xa5   : > { %v2097_v51 = vadd.f32 %v1996_v3, %v1852_v6  ;;  %v2098_v47 = vadd.f32 %v1998_v48, %v1853_v62  ;;  %v465_v13 = vmul.f32 %v3914_v2, %v4008_v41  ;;  %v466_v10 = vmul.f32 %v3914_v2, %v4010_v5 }
  0xa6   : > { %v427_v39 = vadd.f32 %v395_v36, %v325_v1  ;;  %v428_v52 = vadd.f32 %v396_v30, %v326_v26  ;;  %v4028_v20 = vunpack.c.l.bf16 %v546_v0  ;;  %v4030_v56 = vunpack.c.h.bf16 %v546_v0 }
  0xa7   : > { %v2136_v6 = vadd.f32 %v4035_v32, %v2097_v51  ;;  %v2137_v62 = vadd.f32 %v4035_v32, %v2098_v47  ;;  %v4039_v21 = vunpack.c.l.bf16 %v548_v33  ;;  %v653_v15 = vmul.f32 %v3931_v40, %v3682_v42 }
  0xa8   : > { %4948 = vst [vmem:[#allocation31_spill] sm:$0xff] %v4028_v20  ;;  %v497_v18 = vadd.f32 %v465_v13, %v427_v39  ;;  %v498_v29 = vadd.f32 %v466_v10, %v428_v52  ;;  %v654_v58 = vmul.f32 %v3931_v40, %v3684_v43  ;;  %v655_v59 = vmul.f32 %v3931_v40, %v3687_v38  ;;  %v1364_v10 = vld [vmem:[%s3318_s29 + $0x9c] sm:$0xe] }
  0xa9   : > { %4949 = vst [vmem:[#allocation32_spill] sm:$0xff] %v4039_v21  ;;  %v2168_v23 = vmax.f32 %v2136_v6, 0.0  ;;  %v2169_v3 = vmax.f32 %v2137_v62, 0.0  ;;  %v772_v48 = vrot.slane %v653_v15, 1  ;;  %v899_v0 = vmul.f32 %v3942_v4, %v3810_v35 }
  0xaa   : > { %v773_v1 = vrot.slane %v654_v58, 1  ;;  %v775_v26 = vrot.slane %v655_v59, 1  ;;  %v900_v36 = vmul.f32 %v3942_v4, %v3814_v45  ;;  %v901_v30 = vmul.f32 %v3942_v4, %v3831_v27 }
  0xab   : > { %v2197_v33 = vpack.c.bf16 %v2169_v3, %v2168_v23  ;;  %v1017_v51 = vrot.slane %v899_v0, 1  ;;  %v1144_v47 = vmul.f32 %v3953_v63, %v4028_v20  ;;  %v1145_v13 = vmul.f32 %v3953_v63, %v4030_v56 }
  0xac   : > { %v774_v39 = vsel %vm716_vm0, %v772_v48, %v773_v1  ;;  %v776_v52 = vsel %vm716_vm0, %v773_v1, %v775_v26  ;;  %v1018_v6 = vrot.slane %v900_v36, 1  ;;  %v1020_v62 = vrot.slane %v901_v30, 1 }
  0xad   : > { %3177 = vmatmul.mubr.bf16.gmra.mrb[4].mxu0 %v2197_v33  ;;  %v851_v15 = vadd.f32 %v774_v39, %v497_v18  ;;  %v852_v58 = vadd.f32 %v776_v52, %v498_v29  ;;  %v1146_v59 = vmul.f32 %v3953_v63, %v4039_v21  ;;  %v1262_v23 = vrot.slane %v1144_v47, 1 }
  0xae   : > { %v1019_v3 = vsel %vm716_vm0, %v1017_v51, %v1018_v6  ;;  %v1021_v0 = vsel %vm716_vm0, %v1018_v6, %v1020_v62  ;;  %v1263_v42 = vrot.slane %v1145_v13, 1  ;;  %v4064_v57 = vunpack.c.l.bf16 %v1364_v10 }
  0xaf   : > { %v1096_v49 = vadd.f32 %v1019_v3, %v851_v15  ;;  %v1097_v48 = vadd.f32 %v1021_v0, %v852_v58  ;;  %v1265_v44 = vrot.slane %v1146_v59, 1  ;;  %v1425_v1 = vmul.f32 %v3971_v19, %v3712_v31 }
  0xb0   : > { %v1264_v18 = vsel %vm716_vm0, %v1262_v23, %v1263_v42  ;;  %v1426_v29 = vmul.f32 %v3971_v19, %v3684_v43  ;;  %v1427_v26 = vmul.f32 %v3971_v19, %v3687_v38  ;;  %v1671_v36 = vmul.f32 %v3984_v24, %v3856_v12  ;;  %v551_v43 = vld [vmem:[%s3318_s29 + $0xb0] sm:$0x1] }
  0xb1   : > { %v1266_v30 = vsel %vm716_vm0, %v1263_v42, %v1265_v44  ;;  %v1341_v33 = vadd.f32 %v1264_v18, %v1096_v49  ;;  %v1544_v51 = vrot.slane %v1425_v1, 2  ;;  %v1672_v47 = vmul.f32 %v3984_v24, %v3814_v45  ;;  %v3103_v44 = vld [vmem:[%s3318_s29 + $0x48] sm:$0xff]  }
  0xb2   : > { %v1342_v31 = vadd.f32 %v1266_v30, %v1097_v48  ;;  %v1545_v13 = vrot.slane %v1426_v29, 2  ;;  %v1547_v10 = vrot.slane %v1427_v26, 2  ;;  %v1673_v39 = vmul.f32 %v3984_v24, %v3831_v27 }
  0xb3   : > { %v1789_v52 = vrot.slane %v1671_v36, 2  ;;  %v1790_v6 = vrot.slane %v1672_v47, 2  ;;  %v1916_v62 = vmul.f32 %v3996_v46, %v4064_v57  ;;  %v1917_v15 = vmul.f32 %v3996_v46, %v4030_v56 }
  0xb4   : > { %v1546_v49 = vsel %vm1488_vm1, %v1544_v51, %v1545_v13  ;;  %v1548_v42 = vsel %vm1488_vm1, %v1545_v13, %v1547_v10  ;;  %v1792_v58 = vrot.slane %v1673_v39, 2  ;;  %v1918_v59 = vmul.f32 %v3996_v46, %v4039_v21  ;;  %v527_v13 = vld [vmem:[%s3318_s29 + $0x50] sm:$0x1] }
  0xb5   : > { %v1623_v23 = vadd.f32 %v1546_v49, %v1341_v33  ;;  %v1624_v3 = vadd.f32 %v1548_v42, %v1342_v31  ;;  %v1791_v0 = vsel %vm1488_vm1, %v1789_v52, %v1790_v6  ;;  %v2034_v48 = vrot.slane %v1916_v62, 2 }
  0xb6   : > { %v1793_v1 = vsel %vm1488_vm1, %v1790_v6, %v1792_v58  ;;  %v2035_v18 = vrot.slane %v1917_v15, 2  ;;  %v2037_v29 = vrot.slane %v1918_v59, 2  ;;  %v4091_v26 = vunpack.c.l.bf16 %v3103_v44 }
  0xb7   : > { %v1868_v36 = vadd.f32 %v1791_v0, %v1623_v23  ;;  %v1869_v30 = vadd.f32 %v1793_v1, %v1624_v3  ;;  %v4093_v51 = vunpack.c.h.bf16 %v3103_v44  ;;  %v311_v47 = vmul.f32 %v3892_v28, %v3739_v25 }
  0xb8   : > { %v2036_v33 = vsel %vm1488_vm1, %v2034_v48, %v2035_v18  ;;  %v2038_v31 = vsel %vm1488_vm1, %v2035_v18, %v2037_v29  ;;  %v312_v10 = vmul.f32 %v3892_v28, %v3741_v14  ;;  %v381_v39 = vmul.f32 %v3901_v50, %v3883_v54 }
  0xb9   : > { %v2113_v52 = vadd.f32 %v2036_v33, %v1868_v36  ;;  %v2114_v6 = vadd.f32 %v2038_v31, %v1869_v30  ;;  %v382_v62 = vmul.f32 %v3901_v50, %v3887_v60  ;;  %v451_v15 = vmul.f32 %v3914_v2, %v4091_v26 }
  0xba   : > { %v413_v44 = vadd.f32 %v381_v39, %v311_v47  ;;  %v452_v49 = vmul.f32 %v3914_v2, %v4093_v51  ;;  %v4110_v42 = vunpack.c.l.bf16 %v527_v13  ;;  %v632_v58 = vmul.f32 %v3931_v40, %v3739_v25 }
  0xbb   : > { %v2152_v59 = vadd.f32 %v4035_v32, %v2113_v52  ;;  %v2153_v23 = vadd.f32 %v4035_v32, %v2114_v6  ;;  %v414_v3 = vadd.f32 %v382_v62, %v312_v10  ;;  %v633_v0 = vmul.f32 %v3931_v40, %v3741_v14 }
  0xbc   : > { %v483_v48 = vadd.f32 %v451_v15, %v413_v44  ;;  %v634_v1 = vmul.f32 %v3931_v40, %v3758_v55  ;;  %v737_v18 = vrot.slane %v632_v58, 1  ;;  %v878_v29 = vmul.f32 %v3942_v4, %v3920_v22  ;;  %v1357_v44 = vld [vmem:[%s3318_s29 + $0x48] sm:$0xe] }
  0xbd   : > { %v2184_v36 = vmax.f32 %v2152_v59, 0.0  ;;  %v2185_v30 = vmax.f32 %v2153_v23, 0.0  ;;  %v484_v47 = vadd.f32 %v452_v49, %v414_v3  ;;  %v738_v13 = vrot.slane %v633_v0, 1 }
  0xbe   : > { %v740_v33 = vrot.slane %v634_v1, 1  ;;  %v879_v31 = vmul.f32 %v3942_v4, %v3922_v34  ;;  %v880_v10 = vmul.f32 %v3942_v4, %v3924_v11  ;;  %v982_v39 = vrot.slane %v878_v29, 1 }
  0xbf   : > { %v2205_v52 = vpack.c.bf16 %v2185_v30, %v2184_v36  ;;  %v739_v6 = vsel %vm716_vm0, %v737_v18, %v738_v13  ;;  %v1123_v62 = vmul.f32 %v3953_v63, %v4091_v26  ;;  %v1124_v15 = vmul.f32 %v3953_v63, %v4093_v51 }
  0xc0   : > { %v741_v49 = vsel %vm716_vm0, %v738_v13, %v740_v33  ;;  %v837_v58 = vadd.f32 %v739_v6, %v483_v48  ;;  %v983_v59 = vrot.slane %v879_v31, 1  ;;  %v985_v23 = vrot.slane %v880_v10, 1 }
  0xc1   : > { %3193 = vmatmul.mubr.bf16.gmra.mrb[4].mxu1 %v2205_v52  ;;  %v838_v3 = vadd.f32 %v741_v49, %v484_v47  ;;  %v1125_v0 = vmul.f32 %v3953_v63, %v4110_v42  ;;  %v1227_v1 = vrot.slane %v1123_v62, 1  ;;  %v1228_v29 = vrot.slane %v1124_v15, 1  ;;  %v3107_v49 = vld [vmem:[%s3318_s29 + $0xa8] sm:$0xff]  }
  0xc2   : > { %v984_v18 = vsel %vm716_vm0, %v982_v39, %v983_v59  ;;  %v986_v36 = vsel %vm716_vm0, %v983_v59, %v985_v23  ;;  %v4137_v30 = vunpack.c.l.bf16 %v1357_v44  ;;  %v1404_v13 = vmul.f32 %v3971_v19, %v3785_v9 }
  0xc3   : > { %v1082_v48 = vadd.f32 %v984_v18, %v837_v58  ;;  %v1083_v33 = vadd.f32 %v986_v36, %v838_v3  ;;  %v1229_v31 = vsel %vm716_vm0, %v1227_v1, %v1228_v29  ;;  %v1230_v47 = vrot.slane %v1125_v0, 1 }
  0xc4   : > { %v1405_v10 = vmul.f32 %v3971_v19, %v3741_v14  ;;  %v1406_v52 = vmul.f32 %v3971_v19, %v3758_v55  ;;  %v1509_v39 = vrot.slane %v1404_v13, 2  ;;  %v1650_v6 = vmul.f32 %v3984_v24, %v3966_v8 }
  0xc5   : > { %v1231_v62 = vsel %vm716_vm0, %v1228_v29, %v1230_v47  ;;  %v1327_v15 = vadd.f32 %v1229_v31, %v1082_v48  ;;  %v1651_v9 = vmul.f32 %v3984_v24, %v3922_v34  ;;  %v1652_v44 = vmul.f32 %v3984_v24, %v3924_v11 }
  0xc6   : > { %v1328_v58 = vadd.f32 %v1231_v62, %v1083_v33  ;;  %v1510_v59 = vrot.slane %v1405_v10, 2  ;;  %v1512_v23 = vrot.slane %v1406_v52, 2  ;;  %v1754_v3 = vrot.slane %v1650_v6, 2 }
  0xc7   : > { %v1755_v0 = vrot.slane %v1651_v9, 2  ;;  %v1757_v1 = vrot.slane %v1652_v44, 2  ;;  %v1895_v18 = vmul.f32 %v3996_v46, %v4137_v30  ;;  %v1896_v29 = vmul.f32 %v3996_v46, %v4093_v51 }
  0xc8   : > { %v1511_v36 = vsel %vm1488_vm1, %v1509_v39, %v1510_v59  ;;  %v1513_v13 = vsel %vm1488_vm1, %v1510_v59, %v1512_v23  ;;  %v1897_v48 = vmul.f32 %v3996_v46, %v4110_v42  ;;  %v4162_v33 = vunpack.c.l.bf16 %v3107_v49 }
  0xc9   : > { %v1609_v31 = vadd.f32 %v1511_v36, %v1327_v15  ;;  %v1610_v47 = vadd.f32 %v1513_v13, %v1328_v58  ;;  %v1756_v10 = vsel %vm1488_vm1, %v1754_v3, %v1755_v0  ;;  %v1758_v52 = vsel %vm1488_vm1, %v1755_v0, %v1757_v1 }
  0xca   : > { %v1999_v6 = vrot.slane %v1895_v18, 2  ;;  %v2000_v62 = vrot.slane %v1896_v29, 2  ;;  %v2002_v9 = vrot.slane %v1897_v48, 2  ;;  %v4166_v44 = vunpack.c.h.bf16 %v3107_v49 }
  0xcb   : > { %v1854_v39 = vadd.f32 %v1756_v10, %v1609_v31  ;;  %v1855_v38 = vadd.f32 %v1758_v52, %v1610_v47  ;;  %v327_v59 = vmul.f32 %v3892_v28, %v3810_v35  ;;  %v328_v23 = vmul.f32 %v3892_v28, %v3814_v45 }
  0xcc   : > { %v2001_v15 = vsel %vm1488_vm1, %v1999_v6, %v2000_v62  ;;  %v2003_v58 = vsel %vm1488_vm1, %v2000_v62, %v2002_v9  ;;  %v397_v3 = vmul.f32 %v3901_v50, %v4008_v41  ;;  %v398_v49 = vmul.f32 %v3901_v50, %v4010_v5 }
  0xcd   : > { %v2099_v0 = vadd.f32 %v2001_v15, %v1854_v39  ;;  %v2100_v1 = vadd.f32 %v2003_v58, %v1855_v38  ;;  %v467_v18 = vmul.f32 %v3914_v2, %v4162_v33  ;;  %v468_v29 = vmul.f32 %v3914_v2, %v4166_v44 }
  0xce   : > { %v429_v36 = vadd.f32 %v397_v3, %v327_v59  ;;  %v430_v13 = vadd.f32 %v398_v49, %v328_v23  ;;  %v4183_v48 = vunpack.c.l.bf16 %v551_v43  ;;  %v656_v31 = vmul.f32 %v3931_v40, %v3810_v35 }
  0xcf   : > { %v2138_v47 = vadd.f32 %v4035_v32, %v2099_v0  ;;  %v2139_v10 = vadd.f32 %v4035_v32, %v2100_v1  ;;  %v657_v38 = vmul.f32 %v3931_v40, %v3814_v45  ;;  %v658_v52 = vmul.f32 %v3931_v40, %v3831_v27  ;;  %v1365_v1 = vld [vmem:[%s3318_s29 + $0xa8] sm:$0xe] }
  0xd0   : > { %v499_v6 = vadd.f32 %v467_v18, %v429_v36  ;;  %v500_v62 = vadd.f32 %v468_v29, %v430_v13  ;;  %v777_v9 = vrot.slane %v656_v31, 1  ;;  %v902_v43 = vmul.f32 %v3942_v4, %v4028_v20 }
  0xd1   : > { %v2170_v39 = vmax.f32 %v2138_v47, 0.0  ;;  %v2171_v59 = vmax.f32 %v2139_v10, 0.0  ;;  %v778_v23 = vrot.slane %v657_v38, 1  ;;  %v780_v15 = vrot.slane %v658_v52, 1 }
  0xd2   : > { %v903_v58 = vmul.f32 %v3942_v4, %v4030_v56  ;;  %v904_v3 = vmul.f32 %v3942_v4, %v4039_v21  ;;  %v1022_v49 = vrot.slane %v902_v43, 1  ;;  %v1147_v0 = vmul.f32 %v3953_v63, %v4162_v33 }
  0xd3   : > { %v2198_v18 = vpack.c.bf16 %v2171_v59, %v2170_v39  ;;  %v779_v29 = vsel %vm716_vm0, %v777_v9, %v778_v23  ;;  %v781_v36 = vsel %vm716_vm0, %v778_v23, %v780_v15  ;;  %v1148_v13 = vmul.f32 %v3953_v63, %v4166_v44 }
  0xd4   : > { %v853_v31 = vadd.f32 %v779_v29, %v499_v6  ;;  %v854_v47 = vadd.f32 %v781_v36, %v500_v62  ;;  %v1023_v10 = vrot.slane %v903_v58, 1  ;;  %v1025_v38 = vrot.slane %v904_v3, 1 }
  0xd5   : > { %3180 = vmatprep.mubr.bf16.mxu0 %v2198_v18  ;;  %v1149_v52 = vmul.f32 %v3953_v63, %v4183_v48  ;;  %v1267_v43 = vrot.slane %v1147_v0, 1  ;;  %v1268_v35 = vrot.slane %v1148_v13, 1  ;;  %v4208_v55 = vunpack.c.l.bf16 %v1365_v1  ;;  %v240_v13 = vld [vmem:[%s3318_s29 + $0x54] sm:$0xff]  }
  0xd6   : > { %v1024_v39 = vsel %vm716_vm0, %v1022_v49, %v1023_v10  ;;  %v1026_v9 = vsel %vm716_vm0, %v1023_v10, %v1025_v38  ;;  %v1428_v59 = vmul.f32 %v3971_v19, %v3856_v12  ;;  %v1429_v6 = vmul.f32 %v3971_v19, %v3814_v45 }
  0xd7   : > { %v1098_v62 = vadd.f32 %v1024_v39, %v853_v31  ;;  %v1099_v23 = vadd.f32 %v1026_v9, %v854_v47  ;;  %v1269_v15 = vsel %vm716_vm0, %v1267_v43, %v1268_v35  ;;  %v1270_v58 = vrot.slane %v1149_v52, 1 }
  0xd8   : > { %v1430_v3 = vmul.f32 %v3971_v19, %v3831_v27  ;;  %v1549_v0 = vrot.slane %v1428_v59, 2  ;;  %v1550_v1 = vrot.slane %v1429_v6, 2  ;;  %v1674_v49 = vmul.f32 %v3984_v24, %v4064_v57 }
  0xd9   : > { %v1271_v18 = vsel %vm716_vm0, %v1268_v35, %v1270_v58  ;;  %v1343_v29 = vadd.f32 %v1269_v15, %v1098_v62  ;;  %v1675_v12 = vmul.f32 %v3984_v24, %v4030_v56  ;;  %v1676_v36 = vmul.f32 %v3984_v24, %v4039_v21 }
  0xda   : > { %v1344_v31 = vadd.f32 %v1271_v18, %v1099_v23  ;;  %v1551_v47 = vsel %vm1488_vm1, %v1549_v0, %v1550_v1  ;;  %v1552_v10 = vrot.slane %v1430_v3, 2  ;;  %v1794_v38 = vrot.slane %v1674_v49, 2 }
  0xdb   : > { %v1625_v52 = vadd.f32 %v1551_v47, %v1343_v29  ;;  %v1795_v43 = vrot.slane %v1675_v12, 2  ;;  %v1797_v39 = vrot.slane %v1676_v36, 2  ;;  %v1919_v9 = vmul.f32 %v3996_v46, %v4208_v55  ;;  %v528_v47 = vld [vmem:[%s3318_s29 + $0x54] sm:$0xff]  }
  0xdc   : > { %v1553_v35 = vsel %vm1488_vm1, %v1550_v1, %v1552_v10  ;;  %v1920_v59 = vmul.f32 %v3996_v46, %v4166_v44  ;;  %v1921_v6 = vmul.f32 %v3996_v46, %v4183_v48  ;;  %v4235_v62 = vunpack.c.l.bf16 %v240_v13  ;;  %v530_v10 = vld [vmem:[%s3318_s29 + $0x5c] sm:$0x1] }
  0xdd   : > { %v1626_v23 = vadd.f32 %v1553_v35, %v1344_v31  ;;  %v1796_v15 = vsel %vm1488_vm1, %v1794_v38, %v1795_v43  ;;  %v1798_v58 = vsel %vm1488_vm1, %v1795_v43, %v1797_v39  ;;  %v2039_v3 = vrot.slane %v1919_v9, 2 }
  0xde   : > { %v1870_v0 = vadd.f32 %v1796_v15, %v1625_v52  ;;  %v2040_v49 = vrot.slane %v1920_v59, 2  ;;  %v2042_v18 = vrot.slane %v1921_v6, 2  ;;  %v4239_v1 = vunpack.c.h.bf16 %v240_v13 }
  0xdf   : > { %v1871_v29 = vadd.f32 %v1798_v58, %v1626_v23  ;;  %v313_v12 = vmul.f32 %v3892_v28, %v3883_v54  ;;  %v314_v36 = vmul.f32 %v3892_v28, %v3887_v60  ;;  %v383_v31 = vmul.f32 %v3901_v50, %v4091_v26 }
  0xe0   : > { %v2041_v38 = vsel %vm1488_vm1, %v2039_v3, %v2040_v49  ;;  %v2043_v52 = vsel %vm1488_vm1, %v2040_v49, %v2042_v18  ;;  %v384_v13 = vmul.f32 %v3901_v50, %v4093_v51  ;;  %v453_v43 = vmul.f32 %v3914_v2, %v4235_v62 }
  0xe1   : > { %v2115_v39 = vadd.f32 %v2041_v38, %v1870_v0  ;;  %v2116_v54 = vadd.f32 %v2043_v52, %v1871_v29  ;;  %v415_v9 = vadd.f32 %v383_v31, %v313_v12  ;;  %v454_v60 = vmul.f32 %v3914_v2, %v4239_v1 }
  0xe2   : > { %v416_v35 = vadd.f32 %v384_v13, %v314_v36  ;;  %v4257_v59 = vunpack.c.l.bf16 %v528_v47  ;;  %v4259_v6 = vunpack.c.h.bf16 %v528_v47  ;;  %v4261_v23 = vunpack.c.l.bf16 %v530_v10 }
  0xe3   : > { %v2154_v15 = vadd.f32 %v4035_v32, %v2115_v39  ;;  %v2155_v58 = vadd.f32 %v4035_v32, %v2116_v54  ;;  %v485_v3 = vadd.f32 %v453_v43, %v415_v9  ;;  %v635_v0 = vmul.f32 %v3931_v40, %v3920_v22 }
  0xe4   : > { %4950 = vst [vmem:[#allocation33_spill] sm:$0xff] %v4257_v59  ;;  %v486_v49 = vadd.f32 %v454_v60, %v416_v35  ;;  %v636_v18 = vmul.f32 %v3931_v40, %v3922_v34  ;;  %v637_v29 = vmul.f32 %v3931_v40, %v3924_v11  ;;  %v881_v12 = vmul.f32 %v3942_v4, %v4091_v26  ;;  %v1358_v35 = vld [vmem:[%s3318_s29 + $0x54] sm:$0xe] }
  0xe5   : > { %v2186_v36 = vmax.f32 %v2154_v15, 0.0  ;;  %v2187_v31 = vmax.f32 %v2155_v58, 0.0  ;;  %v742_v47 = vrot.slane %v635_v0, 1  ;;  %v882_v10 = vmul.f32 %v3942_v4, %v4093_v51 }
  0xe6   : > { %v743_v38 = vrot.slane %v636_v18, 1  ;;  %v745_v52 = vrot.slane %v637_v29, 1  ;;  %v883_v13 = vmul.f32 %v3942_v4, %v4110_v42  ;;  %v987_v43 = vrot.slane %v881_v12, 1 }
  0xe7   : > { %v2206_v39 = vpack.c.bf16 %v2187_v31, %v2186_v36  ;;  %v988_v54 = vrot.slane %v882_v10, 1  ;;  %v1126_v9 = vmul.f32 %v3953_v63, %v4257_v59  ;;  %v1127_v60 = vmul.f32 %v3953_v63, %v4259_v6 }
  0xe8   : > { %v744_v15 = vsel %vm716_vm0, %v742_v47, %v743_v38  ;;  %v746_v58 = vsel %vm716_vm0, %v743_v38, %v745_v52  ;;  %v990_v0 = vrot.slane %v883_v13, 1  ;;  %v1128_v18 = vmul.f32 %v3953_v63, %v4261_v23 }
  0xe9   : > { %3196 = vmatprep.mubr.bf16.mxu1 %v2206_v39  ;;  %v839_v29 = vadd.f32 %v744_v15, %v485_v3  ;;  %v840_v12 = vadd.f32 %v746_v58, %v486_v49  ;;  %v989_v36 = vsel %vm716_vm0, %v987_v43, %v988_v54  ;;  %v1232_v31 = vrot.slane %v1126_v9, 1 }
  0xea   : > { %v991_v10 = vsel %vm716_vm0, %v988_v54, %v990_v0  ;;  %v1233_v22 = vrot.slane %v1127_v60, 1  ;;  %v1235_v27 = vrot.slane %v1128_v18, 1  ;;  %v4288_v45 = vunpack.c.l.bf16 %v1358_v35  ;;  %v256_v18 = vld [vmem:[%s3318_s29 + $0xb4] sm:$0xff]  }
  0xeb   : > { %v1084_v14 = vadd.f32 %v989_v36, %v839_v29  ;;  %v1085_v47 = vadd.f32 %v991_v10, %v840_v12  ;;  %v1407_v38 = vmul.f32 %v3971_v19, %v3966_v8  ;;  %v1408_v52 = vmul.f32 %v3971_v19, %v3922_v34 }
  0xec   : > { %v1234_v3 = vsel %vm716_vm0, %v1232_v31, %v1233_v22  ;;  %v1236_v49 = vsel %vm716_vm0, %v1233_v22, %v1235_v27  ;;  %v1409_v13 = vmul.f32 %v3971_v19, %v3924_v11  ;;  %v1653_v43 = vmul.f32 %v3984_v24, %v4137_v30 }
  0xed   : > { %v1329_v39 = vadd.f32 %v1234_v3, %v1084_v14  ;;  %v1330_v54 = vadd.f32 %v1236_v49, %v1085_v47  ;;  %v1514_v9 = vrot.slane %v1407_v38, 2  ;;  %v1515_v60 = vrot.slane %v1408_v52, 2 }
  0xee   : > { %v1517_v35 = vrot.slane %v1409_v13, 2  ;;  %v1654_v8 = vmul.f32 %v3984_v24, %v4093_v51  ;;  %v1655_v15 = vmul.f32 %v3984_v24, %v4110_v42  ;;  %v1759_v58 = vrot.slane %v1653_v43, 2 }
  0xef   : > { %v1516_v27 = vsel %vm1488_vm1, %v1514_v9, %v1515_v60  ;;  %v1898_v22 = vmul.f32 %v3996_v46, %v4288_v45  ;;  %v1899_v0 = vmul.f32 %v3996_v46, %v4259_v6  ;;  %v1900_v14 = vmul.f32 %v3996_v46, %v4261_v23 }
  0xf0   : > { %v1518_v29 = vsel %vm1488_vm1, %v1515_v60, %v1517_v35  ;;  %v1611_v12 = vadd.f32 %v1516_v27, %v1329_v39  ;;  %v1760_v36 = vrot.slane %v1654_v8, 2  ;;  %v1762_v31 = vrot.slane %v1655_v15, 2  ;;  %v552_v35 = vld [vmem:[%s3318_s29 + $0xb4] sm:$0xff]   ;;  %v554_v27 = vld [vmem:[%s3318_s29 + $0xbc] sm:$0x1] }
  0xf1   : > { %v1612_v10 = vadd.f32 %v1518_v29, %v1330_v54  ;;  %v2004_v47 = vrot.slane %v1898_v22, 2  ;;  %v2005_v38 = vrot.slane %v1899_v0, 2  ;;  %v2007_v52 = vrot.slane %v1900_v14, 2 }
  0xf2   : > { %v1761_v3 = vsel %vm1488_vm1, %v1759_v58, %v1760_v36  ;;  %v1763_v49 = vsel %vm1488_vm1, %v1760_v36, %v1762_v31  ;;  %v4315_v13 = vunpack.c.l.bf16 %v256_v18  ;;  %v4317_v43 = vunpack.c.h.bf16 %v256_v18 }
  0xf3   : > { %v1856_v9 = vadd.f32 %v1761_v3, %v1611_v12  ;;  %v1857_v11 = vadd.f32 %v1763_v49, %v1612_v10  ;;  %v2006_v60 = vsel %vm1488_vm1, %v2004_v47, %v2005_v38  ;;  %v2008_v39 = vsel %vm1488_vm1, %v2005_v38, %v2007_v52 }
  0xf4   : > { %v329_v54 = vmul.f32 %v3892_v28, %v4008_v41  ;;  %v330_v8 = vmul.f32 %v3892_v28, %v4010_v5  ;;  %v399_v15 = vmul.f32 %v3901_v50, %v4162_v33  ;;  %v400_v58 = vmul.f32 %v3901_v50, %v4166_v44 }
  0xf5   : > { %v2101_v22 = vadd.f32 %v2006_v60, %v1856_v9  ;;  %v2102_v0 = vadd.f32 %v2008_v39, %v1857_v11  ;;  %v469_v14 = vmul.f32 %v3914_v2, %v4315_v13  ;;  %v470_v18 = vmul.f32 %v3914_v2, %v4317_v43 }
  0xf6   : > { %v431_v29 = vadd.f32 %v399_v15, %v329_v54  ;;  %v432_v41 = vadd.f32 %v400_v58, %v330_v8  ;;  %v4335_v12 = vunpack.c.l.bf16 %v552_v35  ;;  %v4337_v5 = vunpack.c.h.bf16 %v552_v35 }
  0xf7   : > { %v2140_v36 = vadd.f32 %v4035_v32, %v2101_v22  ;;  %v2141_v31 = vadd.f32 %v4035_v32, %v2102_v0  ;;  %v4341_v10 = vunpack.c.l.bf16 %v554_v27  ;;  %v659_v11 = vmul.f32 %v3931_v40, %v4028_v20 }
  0xf8   : > { %v501_v47 = vadd.f32 %v469_v14, %v431_v29  ;;  %v502_v38 = vadd.f32 %v470_v18, %v432_v41  ;;  %v660_v52 = vmul.f32 %v3931_v40, %v4030_v56  ;;  %v661_v3 = vmul.f32 %v3931_v40, %v4039_v21  ;;  %v1366_v14 = vld [vmem:[%s3318_s29 + $0xb4] sm:$0xe] }
  0xf9   : > { %v2172_v49 = vmax.f32 %v2140_v36, 0.0  ;;  %v2173_v9 = vmax.f32 %v2141_v31, 0.0  ;;  %v782_v60 = vrot.slane %v659_v11, 1  ;;  %v905_v39 = vmul.f32 %v3942_v4, %v4162_v33 }
  0xfa   : > { %v783_v35 = vrot.slane %v660_v52, 1  ;;  %v785_v54 = vrot.slane %v661_v3, 1  ;;  %v906_v8 = vmul.f32 %v3942_v4, %v4166_v44  ;;  %v907_v15 = vmul.f32 %v3942_v4, %v4183_v48 }
  0xfb   : > { %v2199_v58 = vpack.c.bf16 %v2173_v9, %v2172_v49  ;;  %v1027_v27 = vrot.slane %v905_v39, 1  ;;  %v1150_v22 = vmul.f32 %v3953_v63, %v4335_v12  ;;  %v1151_v0 = vmul.f32 %v3953_v63, %v4337_v5 }
  0xfc   : > { %v784_v18 = vsel %vm716_vm0, %v782_v60, %v783_v35  ;;  %v786_v29 = vsel %vm716_vm0, %v783_v35, %v785_v54  ;;  %v1028_v41 = vrot.slane %v906_v8, 1  ;;  %v1030_v36 = vrot.slane %v907_v15, 1 }
  0xfd   : > { %3181 = vmatmul.mubr.bf16.gmra.mrb[8].mxu0 %v2199_v58  ;;  %v855_v31 = vadd.f32 %v784_v18, %v501_v47  ;;  %v856_v11 = vadd.f32 %v786_v29, %v502_v38  ;;  %v1152_v52 = vmul.f32 %v3953_v63, %v4341_v10  ;;  %v1272_v3 = vrot.slane %v1150_v22, 1 }
  0xfe   : > { %v1029_v49 = vsel %vm716_vm0, %v1027_v27, %v1028_v41  ;;  %v1031_v9 = vsel %vm716_vm0, %v1028_v41, %v1030_v36  ;;  %v1273_v39 = vrot.slane %v1151_v0, 1  ;;  %v4366_v20 = vunpack.c.l.bf16 %v1366_v14 }
  0xff   : > { %v1100_v34 = vadd.f32 %v1029_v49, %v855_v31  ;;  %v1101_v60 = vadd.f32 %v1031_v9, %v856_v11  ;;  %v1275_v25 = vrot.slane %v1152_v52, 1  ;;  %v1431_v35 = vmul.f32 %v3971_v19, %v4064_v57 }
 0x100   : > { %v1274_v47 = vsel %vm716_vm0, %v1272_v3, %v1273_v39  ;;  %v1432_v38 = vmul.f32 %v3971_v19, %v4030_v56  ;;  %v1433_v54 = vmul.f32 %v3971_v19, %v4039_v21  ;;  %v1677_v8 = vmul.f32 %v3984_v24, %v4208_v55 }
 0x101   : > { %v1276_v15 = vsel %vm716_vm0, %v1273_v39, %v1275_v25  ;;  %v1345_v58 = vadd.f32 %v1274_v47, %v1100_v34  ;;  %v1554_v27 = vrot.slane %v1431_v35, 2  ;;  %v1678_v22 = vmul.f32 %v3984_v24, %v4166_v44 }
 0x102   : > { %v1346_v0 = vadd.f32 %v1276_v15, %v1101_v60  ;;  %v1555_v57 = vrot.slane %v1432_v38, 2  ;;  %v1557_v14 = vrot.slane %v1433_v54, 2  ;;  %v1679_v18 = vmul.f32 %v3984_v24, %v4183_v48 }
 0x103   : > { %v1799_v29 = vrot.slane %v1677_v8, 2  ;;  %v1800_v41 = vrot.slane %v1678_v22, 2  ;;  %v1922_v36 = vmul.f32 %v3996_v46, %v4366_v20  ;;  %v1923_v31 = vmul.f32 %v3996_v46, %v4337_v5 }
 0x104   : > { %v1556_v25 = vsel %vm1488_vm1, %v1554_v27, %v1555_v57  ;;  %v1558_v34 = vsel %vm1488_vm1, %v1555_v57, %v1557_v14  ;;  %v1802_v11 = vrot.slane %v1679_v18, 2  ;;  %v1924_v52 = vmul.f32 %v3996_v46, %v4341_v10 }
 0x105   : > { %v1627_v3 = vadd.f32 %v1556_v25, %v1345_v58  ;;  %v1628_v49 = vadd.f32 %v1558_v34, %v1346_v0  ;;  %v1801_v9 = vsel %vm1488_vm1, %v1799_v29, %v1800_v41  ;;  %v2044_v39 = vrot.slane %v1922_v36, 2 }
 0x106   : > { %v1803_v60 = vsel %vm1488_vm1, %v1800_v41, %v1802_v11  ;;  %v2045_v35 = vrot.slane %v1923_v31, 2  ;;  %v2047_v47 = vrot.slane %v1924_v52, 2  ;;  %v315_v38 = vmul.f32 %v3892_v28, %v4091_v26 }
 0x107   : > { %v1872_v54 = vadd.f32 %v1801_v9, %v1627_v3  ;;  %v1873_v8 = vadd.f32 %v1803_v60, %v1628_v49  ;;  %v316_v15 = vmul.f32 %v3892_v28, %v4093_v51  ;;  %v385_v27 = vmul.f32 %v3901_v50, %v4235_v62 }
 0x108   : > { %v2046_v58 = vsel %vm1488_vm1, %v2044_v39, %v2045_v35  ;;  %v2048_v22 = vsel %vm1488_vm1, %v2045_v35, %v2047_v47  ;;  %v386_v0 = vmul.f32 %v3901_v50, %v4239_v1  ;;  %v455_v57 = vmul.f32 %v3914_v2, %v3454_v37 }
 0x109   : > { %v2117_v14 = vadd.f32 %v2046_v58, %v1872_v54  ;;  %v2118_v18 = vadd.f32 %v2048_v22, %v1873_v8  ;;  %v417_v29 = vadd.f32 %v385_v27, %v315_v38  ;;  %v456_v41 = vmul.f32 %v3914_v2, %v3480_v61 }
 0x10a   : > { %v418_v28 = vadd.f32 %v386_v0, %v316_v15  ;;  %v638_v36 = vmul.f32 %v3931_v40, %v4091_v26  ;;  %v639_v31 = vmul.f32 %v3931_v40, %v4093_v51  ;;  %v640_v25 = vmul.f32 %v3931_v40, %v4110_v42 }
 0x10b   : > { %v2156_v50 = vadd.f32 %v4035_v32, %v2117_v14  ;;  %v2157_v34 = vadd.f32 %v4035_v32, %v2118_v18  ;;  %v487_v11 = vadd.f32 %v455_v57, %v417_v29  ;;  %v884_v52 = vmul.f32 %v3942_v4, %v4257_v59 }
 0x10c   : > { %v488_v3 = vadd.f32 %v456_v41, %v418_v28  ;;  %v747_v2 = vrot.slane %v638_v36, 1  ;;  %v748_v49 = vrot.slane %v639_v31, 1  ;;  %v750_v9 = vrot.slane %v640_v25, 1 }
 0x10d   : > { %v2188_v39 = vmax.f32 %v2156_v50, 0.0  ;;  %v2189_v60 = vmax.f32 %v2157_v34, 0.0  ;;  %v885_v35 = vmul.f32 %v3942_v4, %v4259_v6  ;;  %v886_v40 = vmul.f32 %v3942_v4, %v4261_v23 }
 0x10e   : > { %v749_v47 = vsel %vm716_vm0, %v747_v2, %v748_v49  ;;  %v751_v38 = vsel %vm716_vm0, %v748_v49, %v750_v9  ;;  %v992_v54 = vrot.slane %v884_v52, 1  ;;  %v1129_v8 = vmul.f32 %v3953_v63, %v3454_v37 }
 0x10f   : > { %v2207_v15 = vpack.c.bf16 %v2189_v60, %v2188_v39  ;;  %v841_v27 = vadd.f32 %v749_v47, %v487_v11  ;;  %v842_v58 = vadd.f32 %v751_v38, %v488_v3  ;;  %v993_v22 = vrot.slane %v885_v35, 1  ;;  %v3108_v35 = vld [vmem:[%s3318_s29 + $0xc0] sm:$0xff]  }
 0x110   : > { %v995_v0 = vrot.slane %v886_v40, 1  ;;  %v1130_v57 = vmul.f32 %v3953_v63, %v3480_v61  ;;  %v1131_v14 = vmul.f32 %v3953_v63, %v3514_v16  ;;  %v1237_v4 = vrot.slane %v1129_v8, 1 }
 0x111   : > { %3197 = vmatmul.mubr.bf16.gmra.mrb[8].mxu1 %v2207_v15  ;;  %v994_v18 = vsel %vm716_vm0, %v992_v54, %v993_v22  ;;  %v1410_v29 = vmul.f32 %v3971_v19, %v4137_v30  ;;  %v1411_v41 = vmul.f32 %v3971_v19, %v4093_v51  ;;  %v1412_v28 = vmul.f32 %v3971_v19, %v4110_v42 }
 0x112   : > { %v996_v36 = vsel %vm716_vm0, %v993_v22, %v995_v0  ;;  %v1086_v31 = vadd.f32 %v994_v18, %v841_v27  ;;  %v1238_v25 = vrot.slane %v1130_v57, 1  ;;  %v1240_v50 = vrot.slane %v1131_v14, 1 }
 0x113   : > { %v1087_v63 = vadd.f32 %v996_v36, %v842_v58  ;;  %v1519_v34 = vrot.slane %v1410_v29, 2  ;;  %v1520_v11 = vrot.slane %v1411_v41, 2  ;;  %v1522_v52 = vrot.slane %v1412_v28, 2  ;;  %v4462_v28 = vld [vmem:[%s4878_s1] ss:$0 sm:$0xff] }
 0x114   : > { %v1239_v3 = vsel %vm716_vm0, %v1237_v4, %v1238_v25  ;;  %v1241_v30 = vsel %vm716_vm0, %v1238_v25, %v1240_v50  ;;  %v1656_v2 = vmul.f32 %v3984_v24, %v4288_v45  ;;  %v1657_v19 = vmul.f32 %v3984_v24, %v4259_v6  ;;  %v557_v50 = vld [vmem:[%s3318_s29 + $0xc8] sm:$0x1] }
 0x115   : > { %v1331_v49 = vadd.f32 %v1239_v3, %v1086_v31  ;;  %v1332_v9 = vadd.f32 %v1241_v30, %v1087_v63  ;;  %v1521_v39 = vsel %vm1488_vm1, %v1519_v34, %v1520_v11  ;;  %v1523_v60 = vsel %vm1488_vm1, %v1520_v11, %v1522_v52  ;;  %v4471_v31 = vld [vmem:[%s4878_s1 + $0x4] ss:$0 sm:$0xff] }
 0x116   : > { %v1658_v40 = vmul.f32 %v3984_v24, %v4261_v23  ;;  %v1764_v47 = vrot.slane %v1656_v2, 2  ;;  %v1765_v38 = vrot.slane %v1657_v19, 2  ;;  %v1901_v54 = vmul.f32 %v3996_v46, %v3550_v53  ;;  %v4483_v2 = vld [vmem:[%s4878_s1 + $0x8] ss:$0 sm:$0xff] }
 0x117   : > { %v1613_v8 = vadd.f32 %v1521_v39, %v1331_v49  ;;  %v1614_v15 = vadd.f32 %v1523_v60, %v1332_v9  ;;  %v1902_v27 = vmul.f32 %v3996_v46, %v3480_v61  ;;  %v1903_v58 = vmul.f32 %v3996_v46, %v3514_v16 }
 0x118   : > { %v1766_v22 = vsel %vm1488_vm1, %v1764_v47, %v1765_v38  ;;  %v1767_v0 = vrot.slane %v1658_v40, 2  ;;  %v2009_v57 = vrot.slane %v1901_v54, 2  ;;  %v4454_v14 = vunpack.c.l.bf16 %v3108_v35 }
 0x119   : > { %v1858_v24 = vadd.f32 %v1766_v22, %v1613_v8  ;;  %v2010_v4 = vrot.slane %v1902_v27, 2  ;;  %v2012_v18 = vrot.slane %v1903_v58, 2  ;;  %v4456_v29 = vunpack.c.h.bf16 %v3108_v35  ;;  %v4494_v35 = vld [vmem:[%s4878_s1 + $0x1] ss:$0 sm:$0xff]  ;;  %v4507_v22 = vld [vmem:[%s4878_s1 + $0x5] ss:$0 sm:$0xff] }
 0x11a   : > { %v1768_v41 = vsel %vm1488_vm1, %v1765_v38, %v1767_v0  ;;  %v331_v46 = vmul.f32 %v4462_v28, %v4162_v33  ;;  %v332_v36 = vmul.f32 %v4462_v28, %v4166_v44  ;;  %v401_v25 = vmul.f32 %v4471_v31, %v4315_v13 }
 0x11b   : > { %v1859_v63 = vadd.f32 %v1768_v41, %v1614_v15  ;;  %v2011_v34 = vsel %vm1488_vm1, %v2009_v57, %v2010_v4  ;;  %v2013_v11 = vsel %vm1488_vm1, %v2010_v4, %v2012_v18  ;;  %v402_v52 = vmul.f32 %v4471_v31, %v4317_v43 }
 0x11c   : > { %v2103_v3 = vadd.f32 %v2011_v34, %v1858_v24  ;;  %v433_v30 = vadd.f32 %v401_v25, %v331_v46  ;;  %v471_v19 = vmul.f32 %v4483_v2, %v4454_v14  ;;  %v472_v49 = vmul.f32 %v4483_v2, %v4456_v29 }
 0x11d   : > { %v2104_v9 = vadd.f32 %v2013_v11, %v1859_v63  ;;  %v434_v39 = vadd.f32 %v402_v52, %v332_v36  ;;  %v4489_v60 = vunpack.c.l.bf16 %v557_v50  ;;  %v662_v40 = vmul.f32 %v4494_v35, %v4162_v33  ;;  %v4518_v36 = vld [vmem:[%s4878_s1 + $0x9] ss:$0 sm:$0xff]  ;;  %v4527_v52 = vld [vmem:[%s3318_s29 + $0xc0] sm:$0xe] }
 0x11e   : > { %v2142_v47 = vadd.f32 %v4035_v32, %v2103_v3  ;;  %v503_v38 = vadd.f32 %v471_v19, %v433_v30  ;;  %v663_v54 = vmul.f32 %v4494_v35, %v4166_v44  ;;  %v664_v8 = vmul.f32 %v4494_v35, %v4183_v48 }
 0x11f   : > { %v2143_v15 = vadd.f32 %v4035_v32, %v2104_v9  ;;  %v504_v27 = vadd.f32 %v472_v49, %v434_v39  ;;  %v787_v58 = vrot.slane %v662_v40, 1  ;;  %v908_v0 = vmul.f32 %v4507_v22, %v4335_v12 }
 0x120   : > { %v2174_v57 = vmax.f32 %v2142_v47, 0.0  ;;  %v788_v24 = vrot.slane %v663_v54, 1  ;;  %v790_v4 = vrot.slane %v664_v8, 1  ;;  %v909_v18 = vmul.f32 %v4507_v22, %v4337_v5 }
 0x121   : > { %v2175_v41 = vmax.f32 %v2143_v15, 0.0  ;;  %v910_v32 = vmul.f32 %v4507_v22, %v4341_v10  ;;  %v1032_v46 = vrot.slane %v908_v0, 1  ;;  %v1153_v25 = vmul.f32 %v4518_v36, %v4454_v14 }
 0x122   : > { %v789_v50 = vsel %vm716_vm0, %v787_v58, %v788_v24  ;;  %v791_v63 = vsel %vm716_vm0, %v788_v24, %v790_v4  ;;  %v1033_v34 = vrot.slane %v909_v18, 1  ;;  %v1154_v11 = vmul.f32 %v4518_v36, %v4456_v29  ;;  %v4537_v58 = vld [vmem:[%s4878_s1 + $0x2] ss:$0 sm:$0xff] }
 0x123   : > { %v2200_v3 = vpack.c.bf16 %v2175_v41, %v2174_v57  ;;  %v857_v30 = vadd.f32 %v789_v50, %v503_v38  ;;  %v858_v19 = vadd.f32 %v791_v63, %v504_v27  ;;  %v1035_v49 = vrot.slane %v910_v32, 1  ;;  %v4549_v32 = vld [vmem:[%s4878_s1 + $0x6] ss:$0 sm:$0xff] }
 0x124   : > { %v1034_v9 = vsel %vm716_vm0, %v1032_v46, %v1033_v34  ;;  %v1155_v39 = vmul.f32 %v4518_v36, %v4489_v60  ;;  %v1277_v40 = vrot.slane %v1153_v25, 1  ;;  %v1278_v47 = vrot.slane %v1154_v11, 1 }
 0x125   : > { %3184 = vmatprep.mubr.bf16.mxu0 %v2200_v3  ;;  %v1036_v54 = vsel %vm716_vm0, %v1033_v34, %v1035_v49  ;;  %v1102_v8 = vadd.f32 %v1034_v9, %v857_v30  ;;  %v4915_v15 = vunpack.c.l.bf16 %v4527_v52  ;;  %v1434_v38 = vmul.f32 %v4537_v58, %v4208_v55  ;;  %v4561_v30 = vld [vmem:[%s4878_s1 + $0xa] ss:$0 sm:$0xff] }
 0x126   : > { %v1103_v27 = vadd.f32 %v1036_v54, %v858_v19  ;;  %v1279_v0 = vsel %vm716_vm0, %v1277_v40, %v1278_v47  ;;  %v1280_v57 = vrot.slane %v1155_v39, 1  ;;  %v1435_v24 = vmul.f32 %v4537_v58, %v4166_v44 }
 0x127   : > { %v1347_v4 = vadd.f32 %v1279_v0, %v1102_v8  ;;  %v1436_v18 = vmul.f32 %v4537_v58, %v4183_v48  ;;  %v1559_v41 = vrot.slane %v1434_v38, 2  ;;  %v1680_v55 = vmul.f32 %v4549_v32, %v4366_v20 }
 0x128   : > { %v1281_v46 = vsel %vm716_vm0, %v1278_v47, %v1280_v57  ;;  %v1560_v25 = vrot.slane %v1435_v24, 2  ;;  %v1681_v50 = vmul.f32 %v4549_v32, %v4337_v5  ;;  %v1682_v63 = vmul.f32 %v4549_v32, %v4341_v10 }
 0x129   : > { %v1348_v34 = vadd.f32 %v1281_v46, %v1103_v27  ;;  %v1562_v11 = vrot.slane %v1436_v18, 2  ;;  %v1804_v3 = vrot.slane %v1680_v55, 2  ;;  %v1925_v19 = vmul.f32 %v4561_v30, %v4915_v15  ;;  %v4953_v15 = vld [vmem:[#allocation13_spill] sm:$0xff] }
 0x12a   : > { %v1561_v49 = vsel %vm1488_vm1, %v1559_v41, %v1560_v25  ;;  %v1805_v9 = vrot.slane %v1681_v50, 2  ;;  %v1807_v39 = vrot.slane %v1682_v63, 2  ;;  %v1926_v40 = vmul.f32 %v4561_v30, %v4456_v29 }
 0x12b   : > { %v1563_v47 = vsel %vm1488_vm1, %v1560_v25, %v1562_v11  ;;  %v1629_v54 = vadd.f32 %v1561_v49, %v1347_v4  ;;  %v1927_v8 = vmul.f32 %v4561_v30, %v4489_v60  ;;  %v2049_v38 = vrot.slane %v1925_v19, 2 }
 0x12c   : > { %v1630_v27 = vadd.f32 %v1563_v47, %v1348_v34  ;;  %v1806_v0 = vsel %vm1488_vm1, %v1804_v3, %v1805_v9  ;;  %v1808_v57 = vsel %vm1488_vm1, %v1805_v9, %v1807_v39  ;;  %v2050_v24 = vrot.slane %v1926_v40, 2  ;;  %v4595_v40 = vld [vmem:[%s4879_s2] ss:$0 sm:$0xff] }
 0x12d   : > { %v1874_v18 = vadd.f32 %v1806_v0, %v1629_v54  ;;  %v2052_v41 = vrot.slane %v1927_v8, 2  ;;  %v317_v55 = vmul.f32 %v4462_v28, %v4235_v62  ;;  %v318_v46 = vmul.f32 %v4462_v28, %v4239_v1 }
 0x12e   : > { %v1875_v25 = vadd.f32 %v1808_v57, %v1630_v27  ;;  %v2051_v4 = vsel %vm1488_vm1, %v2049_v38, %v2050_v24  ;;  %v387_v50 = vmul.f32 %v4471_v31, %v3454_v37  ;;  %v388_v63 = vmul.f32 %v4471_v31, %v3480_v61 }
 0x12f   : > { %v2053_v34 = vsel %vm1488_vm1, %v2050_v24, %v2052_v41  ;;  %v2119_v11 = vadd.f32 %v2051_v4, %v1874_v18  ;;  %v457_v3 = vmul.f32 %v4483_v2, %v3492_v7  ;;  %v458_v62 = vmul.f32 %v4483_v2, %v3494_v17 }
 0x130   : > { %v2120_v19 = vadd.f32 %v2053_v34, %v1875_v25  ;;  %v419_v1 = vadd.f32 %v387_v50, %v317_v55  ;;  %v420_v49 = vadd.f32 %v388_v63, %v318_v46  ;;  %v641_v9 = vmul.f32 %v4494_v35, %v4257_v59  ;;  %v4590_v39 = vpop.f32.mrb[0].mxu0  ;;  %v4951_v34 = vld [vmem:[#allocation11_spill] sm:$0xff] }
 0x131   : > { %v2158_v47 = vadd.f32 %v4595_v40, %v2119_v11  ;;  %v642_v7 = vmul.f32 %v4494_v35, %v4259_v6  ;;  %v643_v17 = vmul.f32 %v4494_v35, %v4261_v23  ;;  %v887_v54 = vmul.f32 %v4507_v22, %v3454_v37  ;;  %v4604_v8 = vpop.f32.mrb[1].mxu0 }
 0x132   : > { %v2159_v38 = vadd.f32 %v4595_v40, %v2120_v19  ;;  %v489_v27 = vadd.f32 %v457_v3, %v419_v1  ;;  %v490_v0 = vadd.f32 %v458_v62, %v420_v49  ;;  %v752_v57 = vrot.slane %v641_v9, 1  ;;  %v4607_v24 = vpop.f32.mrb[2].mxu0  ;;  %v4952_v1 = vld [vmem:[#allocation12_spill] sm:$0xff] }
 0x133   : > { %v2190_v18 = vmax.f32 %v2158_v47, 0.0  ;;  %v753_v41 = vrot.slane %v642_v7, 1  ;;  %v755_v55 = vrot.slane %v643_v17, 1  ;;  %v888_v46 = vmul.f32 %v4507_v22, %v3480_v61  ;;  %v4611_v25 = vpop.f32.mrb[3].mxu0 }
 0x134   : > { %v2191_v4 = vmax.f32 %v2159_v38, 0.0  ;;  %v889_v50 = vmul.f32 %v4507_v22, %v3514_v16  ;;  %v997_v63 = vrot.slane %v887_v54, 1  ;;  %v1132_v11 = vmul.f32 %v4518_v36, %v4951_v34 }
 0x135   : > { %v754_v3 = vsel %vm716_vm0, %v752_v57, %v753_v41  ;;  %v756_v62 = vsel %vm716_vm0, %v753_v41, %v755_v55  ;;  %v998_v19 = vrot.slane %v888_v46, 1  ;;  %v1133_v49 = vmul.f32 %v4518_v36, %v4952_v1 }
 0x136   : > { %v2208_v9 = vpack.c.bf16 %v2191_v4, %v2190_v18  ;;  %v843_v47 = vadd.f32 %v754_v3, %v489_v27  ;;  %v844_v7 = vadd.f32 %v756_v62, %v490_v0  ;;  %v1000_v17 = vrot.slane %v889_v50, 1 }
 0x137   : > { %v999_v38 = vsel %vm716_vm0, %v997_v63, %v998_v19  ;;  %v1134_v54 = vmul.f32 %v4518_v36, %v4953_v15  ;;  %v1242_v59 = vrot.slane %v1132_v11, 1  ;;  %v1243_v37 = vrot.slane %v1133_v49, 1 }
 0x138   : > { %3200 = vmatprep.mubr.bf16.mxu1 %v2208_v9  ;;  %v1001_v57 = vsel %vm716_vm0, %v998_v19, %v1000_v17  ;;  %v1088_v21 = vadd.f32 %v999_v38, %v843_v47  ;;  %v1413_v41 = vmul.f32 %v4537_v58, %v4288_v45  ;;  %v1414_v18 = vmul.f32 %v4537_v58, %v4259_v6  ;;  %v4954_v47 = vld [vmem:[#allocation15_spill] sm:$0xff] }
 0x139   : > { %v1089_v27 = vadd.f32 %v1001_v57, %v844_v7  ;;  %v1244_v0 = vsel %vm716_vm0, %v1242_v59, %v1243_v37  ;;  %v1245_v55 = vrot.slane %v1134_v54, 1  ;;  %v1415_v46 = vmul.f32 %v4537_v58, %v4261_v23  ;;  %v260_v7 = vld [vmem:[%s3318_s29 + $0xcc] sm:$0xff]  }
 0x13a   : > { %v1333_v4 = vadd.f32 %v1244_v0, %v1088_v21  ;;  %v1524_v50 = vrot.slane %v1413_v41, 2  ;;  %v1525_v63 = vrot.slane %v1414_v18, 2  ;;  %v1659_v11 = vmul.f32 %v4549_v32, %v3550_v53 }
 0x13b   : > { %v1246_v3 = vsel %vm716_vm0, %v1243_v37, %v1245_v55  ;;  %v1527_v45 = vrot.slane %v1415_v46, 2  ;;  %v1660_v62 = vmul.f32 %v4549_v32, %v3480_v61  ;;  %v1661_v19 = vmul.f32 %v4549_v32, %v3514_v16 }
 0x13c   : > { %v1334_v59 = vadd.f32 %v1246_v3, %v1089_v27  ;;  %v1526_v49 = vsel %vm1488_vm1, %v1524_v50, %v1525_v63  ;;  %v1769_v9 = vrot.slane %v1659_v11, 2  ;;  %v1904_v21 = vmul.f32 %v4561_v30, %v4954_v47 }
 0x13d   : > { %v1528_v17 = vsel %vm1488_vm1, %v1525_v63, %v1527_v45  ;;  %v1615_v53 = vadd.f32 %v1526_v49, %v1333_v4  ;;  %v1770_v38 = vrot.slane %v1660_v62, 2  ;;  %v1772_v37 = vrot.slane %v1661_v19, 2  ;;  %v4662_v49 = vld [vmem:[%s3318_s29 + $0xd4] sm:$0x1] }
 0x13e   : > { %v1616_v54 = vadd.f32 %v1528_v17, %v1334_v59  ;;  %v1905_v57 = vmul.f32 %v4561_v30, %v4952_v1  ;;  %v1906_v41 = vmul.f32 %v4561_v30, %v4953_v15  ;;  %v2014_v18 = vrot.slane %v1904_v21, 2  ;;  %v4659_v59 = vld [vmem:[%s3318_s29 + $0xcc] sm:$0xff]  }
 0x13f   : > { %v1771_v27 = vsel %vm1488_vm1, %v1769_v9, %v1770_v38  ;;  %v1773_v0 = vsel %vm1488_vm1, %v1770_v38, %v1772_v37  ;;  %v296_v55 = vunpack.c.l.bf16 %v260_v7  ;;  %v297_v46 = vunpack.c.h.bf16 %v260_v7 }
 0x140   : > { %v1860_v50 = vadd.f32 %v1771_v27, %v1615_v53  ;;  %v1861_v4 = vadd.f32 %v1773_v0, %v1616_v54  ;;  %v2015_v63 = vrot.slane %v1905_v57, 2  ;;  %v2017_v11 = vrot.slane %v1906_v41, 2 }
 0x141   : > { %v333_v3 = vmul.f32 %v4462_v28, %v4315_v13  ;;  %v334_v45 = vmul.f32 %v4462_v28, %v4317_v43  ;;  %v403_v62 = vmul.f32 %v4471_v31, %v4454_v14  ;;  %v404_v19 = vmul.f32 %v4471_v31, %v4456_v29 }
 0x142   : > { %v2016_v9 = vsel %vm1488_vm1, %v2014_v18, %v2015_v63  ;;  %v2018_v47 = vsel %vm1488_vm1, %v2015_v63, %v2017_v11  ;;  %v473_v21 = vmul.f32 %v4483_v2, %v296_v55  ;;  %v474_v13 = vmul.f32 %v4483_v2, %v297_v46 }
 0x143   : > { %v2105_v7 = vadd.f32 %v2016_v9, %v1860_v50  ;;  %v2106_v43 = vadd.f32 %v2018_v47, %v1861_v4  ;;  %v435_v28 = vadd.f32 %v403_v62, %v333_v3  ;;  %v436_v17 = vadd.f32 %v404_v19, %v334_v45 }
 0x144   : > { %v612_v53 = vunpack.c.l.bf16 %v4659_v59  ;;  %v613_v31 = vunpack.c.h.bf16 %v4659_v59  ;;  %v614_v38 = vunpack.c.l.bf16 %v4662_v49  ;;  %v665_v37 = vmul.f32 %v4494_v35, %v4335_v12  ;;  %v4673_v54 = vpop.f32.mrb[0].mxu1 }
 0x145   : > { %v2144_v57 = vadd.f32 %v4595_v40, %v2105_v7  ;;  %v2145_v41 = vadd.f32 %v4595_v40, %v2106_v43  ;;  %v505_v2 = vadd.f32 %v473_v21, %v435_v28  ;;  %v506_v18 = vadd.f32 %v474_v13, %v436_v17  ;;  %v4677_v27 = vpop.f32.mrb[1].mxu1  ;;  %v1368_v7 = vld [vmem:[%s3318_s29 + $0xcc] sm:$0xe] }
 0x146   : > { %v666_v0 = vmul.f32 %v4494_v35, %v4337_v5  ;;  %v667_v55 = vmul.f32 %v4494_v35, %v4341_v10  ;;  %v792_v46 = vrot.slane %v665_v37, 1  ;;  %v911_v50 = vmul.f32 %v4507_v22, %v4454_v14  ;;  %v4685_v4 = vpop.f32.mrb[2].mxu1 }
 0x147   : > { %v2176_v63 = vmax.f32 %v2144_v57, 0.0  ;;  %v2177_v11 = vmax.f32 %v2145_v41, 0.0  ;;  %v912_v3 = vmul.f32 %v4507_v22, %v4456_v29  ;;  %v913_v45 = vmul.f32 %v4507_v22, %v4489_v60  ;;  %v4691_v62 = vpop.f32.mrb[3].mxu1 }
 0x148   : > { %v793_v19 = vrot.slane %v666_v0, 1  ;;  %v795_v59 = vrot.slane %v667_v55, 1  ;;  %v1037_v35 = vrot.slane %v911_v50, 1  ;;  %v1156_v49 = vmul.f32 %v4518_v36, %v612_v53 }
 0x149   : > { %v2201_v9 = vpack.c.bf16 %v2177_v11, %v2176_v63  ;;  %v1038_v47 = vrot.slane %v912_v3, 1  ;;  %v1040_v21 = vrot.slane %v913_v45, 1  ;;  %v1157_v13 = vmul.f32 %v4518_v36, %v613_v31 }
 0x14a   : > { %v794_v43 = vsel %vm716_vm0, %v792_v46, %v793_v19  ;;  %v796_v28 = vsel %vm716_vm0, %v793_v19, %v795_v59  ;;  %v1158_v17 = vmul.f32 %v4518_v36, %v614_v38  ;;  %v1282_v22 = vrot.slane %v1156_v49, 1 }
 0x14b   : > { %3185 = vmatmul.mubr.bf16.gmra.mrb[12].mxu0 %v2201_v9  ;;  %v859_v37 = vadd.f32 %v794_v43, %v505_v2  ;;  %v860_v57 = vadd.f32 %v796_v28, %v506_v18  ;;  %v1039_v41 = vsel %vm716_vm0, %v1037_v35, %v1038_v47  ;;  %v1041_v53 = vsel %vm716_vm0, %v1038_v47, %v1040_v21 }
 0x14c   : > { %v1283_v0 = vrot.slane %v1157_v13, 1  ;;  %v1285_v55 = vrot.slane %v1158_v17, 1  ;;  %v1386_v50 = vunpack.c.l.bf16 %v1368_v7  ;;  %v1437_v63 = vmul.f32 %v4537_v58, %v4366_v20  ;;  %v4720_v7 = vld [vmem:[%s4881_s4] ss:$0 sm:$0xff] }
 0x14d   : > { %v1104_v11 = vadd.f32 %v1039_v41, %v859_v37  ;;  %v1105_v46 = vadd.f32 %v1041_v53, %v860_v57  ;;  %v1438_v3 = vmul.f32 %v4537_v58, %v4337_v5  ;;  %v1439_v36 = vmul.f32 %v4537_v58, %v4341_v10 }
 0x14e   : > { %v1284_v2 = vsel %vm716_vm0, %v1282_v22, %v1283_v0  ;;  %v1286_v18 = vsel %vm716_vm0, %v1283_v0, %v1285_v55  ;;  %v1564_v45 = vrot.slane %v1437_v63, 2  ;;  %v4955_v19 = vunpack.c.l.bf16 %v4527_v52 }
 0x14f   : > { %v1349_v35 = vadd.f32 %v1284_v2, %v1104_v11  ;;  %v1350_v49 = vadd.f32 %v1286_v18, %v1105_v46  ;;  %v1565_v20 = vrot.slane %v1438_v3, 2  ;;  %v1567_v9 = vrot.slane %v1439_v36, 2  ;;  %v4956_v11 = vld [vmem:[#allocation2_spill] sm:$0xff]  ;;  %v4957_v3 = vld [vmem:[#allocation3_spill] sm:$0xff] }
 0x150   : > { %v1683_v59 = vmul.f32 %v4549_v32, %v4955_v19  ;;  %v1684_v47 = vmul.f32 %v4549_v32, %v4456_v29  ;;  %v1685_v21 = vmul.f32 %v4549_v32, %v4489_v60  ;;  %v1928_v13 = vmul.f32 %v4561_v30, %v1386_v50 }
 0x151   : > { %v1566_v52 = vsel %vm1488_vm1, %v1564_v45, %v1565_v20  ;;  %v1568_v43 = vsel %vm1488_vm1, %v1565_v20, %v1567_v9  ;;  %v1929_v28 = vmul.f32 %v4561_v30, %v613_v31  ;;  %v1930_v17 = vmul.f32 %v4561_v30, %v614_v38 }
 0x152   : > { %v1809_v58 = vrot.slane %v1683_v59, 2  ;;  %v1631_v22 = vadd.f32 %v1566_v52, %v1349_v35  ;;  %v1632_v37 = vadd.f32 %v1568_v43, %v1350_v49  ;;  %v1810_v57 = vrot.slane %v1684_v47, 2  ;;  %v4958_v59 = vld [vmem:[#allocation9_spill] sm:$0xff]  ;;  %v4959_v35 = vld [vmem:[#allocation10_spill] sm:$0xff] }
 0x153   : > { %v1812_v32 = vrot.slane %v1685_v21, 2  ;;  %v2054_v41 = vrot.slane %v1928_v13, 2  ;;  %v2055_v53 = vrot.slane %v1929_v28, 2  ;;  %v2057_v0 = vrot.slane %v1930_v17, 2  ;;  %v4960_v13 = vld [vmem:[#allocation4_spill] sm:$0xff]  ;;  %v4961_v43 = vld [vmem:[#allocation5_spill] sm:$0xff] }
 0x154   : > { %v2324_v55 = vadd.f32 %v4590_v39, %v4720_v7  ;;  %v1811_v50 = vsel %vm1488_vm1, %v1809_v58, %v1810_v57  ;;  %v2495_v46 = vrot.slane %v4956_v11, 1  ;;  %v2496_v31 = vrot.slane %v4957_v3, 1  ;;  %v4964_v11 = vld [vmem:[#allocation6_spill] sm:$0xff] }
 0x155   : > { %v1813_v63 = vsel %vm1488_vm1, %v1810_v57, %v1812_v32  ;;  %v1876_v36 = vadd.f32 %v1811_v50, %v1631_v22  ;;  %v2056_v38 = vsel %vm1488_vm1, %v2054_v41, %v2055_v53  ;;  %v2058_v2 = vsel %vm1488_vm1, %v2055_v53, %v2057_v0  ;;  %v4962_v57 = vld [vmem:[#allocation7_spill] sm:$0xff]  ;;  %v4963_v0 = vld [vmem:[#allocation14_spill] sm:$0xff] }
 0x156   : > { %v1877_v30 = vadd.f32 %v1813_v63, %v1632_v37  ;;  %v2497_v18 = vsel %vm716_vm0, %v2495_v46, %v2496_v31  ;;  %v2535_v39 = vrot.slane %v4958_v59, 1  ;;  %v2536_v49 = vrot.slane %v4959_v35, 1 }
 0x157   : > { %v2121_v45 = vadd.f32 %v2056_v38, %v1876_v36  ;;  %v2604_v20 = vadd.f32 %v2497_v18, %v2324_v55  ;;  %v2388_v9 = vadd.f32 %v4673_v54, %v4720_v7  ;;  %v2316_v47 = vadd.f32 %v4720_v7, %v4604_v8 }
 0x158   : > { %v2122_v19 = vadd.f32 %v2058_v2, %v1877_v30  ;;  %v2490_v52 = vrot.slane %v4960_v13, 1  ;;  %v2491_v28 = vrot.slane %v4961_v43, 1  ;;  %v2530_v17 = vrot.slane %v4951_v34, 1  ;;  %v4968_v13 = vld [vmem:[#allocation16_spill] sm:$0xff] }
 0x159   : > { %v2160_v21 = vadd.f32 %v4595_v40, %v2121_v45  ;;  %v2531_v22 = vrot.slane %v4952_v1, 1  ;;  %v2327_v37 = vadd.f32 %v4607_v24, %v4720_v7  ;;  %v2498_v54 = vrot.slane %v4962_v57, 1 }
 0x15a   : > { %v2161_v58 = vadd.f32 %v4595_v40, %v2122_v19  ;;  %v2537_v8 = vsel %vm716_vm0, %v2535_v39, %v2536_v49  ;;  %v2391_v40 = vadd.f32 %v4685_v4, %v4720_v7  ;;  %v2380_v53 = vadd.f32 %v4720_v7, %v4677_v27 }
 0x15b   : > { %v2192_v32 = vmax.f32 %v2160_v21, 0.0  ;;  %v2499_v34 = vsel %vm716_vm0, %v2496_v31, %v2498_v54  ;;  %v2538_v1 = vrot.slane %v4963_v0, 1  ;;  %v2319_v24 = vadd.f32 %v4720_v7, %v4611_v25  ;;  %v4967_v21 = vld [vmem:[#allocation24_spill] sm:$0xff] }
 0x15c   : > { %v2193_v41 = vmax.f32 %v2161_v58, 0.0  ;;  %v2492_v50 = vsel %vm716_vm0, %v2490_v52, %v2491_v28  ;;  %v2605_v63 = vadd.f32 %v2499_v34, %v2327_v37  ;;  %v2493_v46 = vrot.slane %v4964_v11, 1  ;;  %v4969_v52 = vld [vmem:[#allocation17_spill] sm:$0xff] }
 0x15d   : > { %v2532_v3 = vsel %vm716_vm0, %v2530_v17, %v2531_v22  ;;  %v2539_v27 = vsel %vm716_vm0, %v2536_v49, %v2538_v1  ;;  %v2383_v25 = vadd.f32 %v4720_v7, %v4691_v62  ;;  %v2533_v4 = vrot.slane %v4953_v15, 1  ;;  %v4965_v15 = vld [vmem:[#allocation22_spill] sm:$0xff] }
 0x15e   : > { %v2209_v55 = vpack.c.bf16 %v2193_v41, %v2192_v32  ;;  %v2620_v31 = vadd.f32 %v2537_v8, %v2388_v9  ;;  %v3029_v36 = vpack.c.bf16 %v2605_v63, %v2604_v20  ;;  %v2621_v30 = vadd.f32 %v2539_v27, %v2391_v40  ;;  %v4966_v9 = vld [vmem:[#allocation23_spill] sm:$0xff] }
 0x15f   : > { %v2494_v38 = vsel %vm716_vm0, %v2491_v28, %v2493_v46  ;;  %v2602_v2 = vadd.f32 %v2492_v50, %v2316_v47  ;;  %v2534_v45 = vsel %vm716_vm0, %v2531_v22, %v2533_v4  ;;  %v2618_v19 = vadd.f32 %v2532_v3, %v2380_v53  ;;  %v4970_v28 = vld [vmem:[#allocation18_spill] sm:$0xff]  ;;  %v4971_v3 = vld [vmem:[#allocation25_spill] sm:$0xff] }
 0x160   : > { %3201 = vmatmul.mubr.bf16.gmra.mrb[12].mxu1 %v2209_v55  ;;  %v2603_v18 = vadd.f32 %v2494_v38, %v2319_v24  ;;  %3117 = vst [vmem:[%s4766_s12 + $0x8] sm:$0xff] %v3029_v36   ;;  %v3069_v59 = vpack.c.bf16 %v2621_v30, %v2620_v31  ;;  %v2619_v39 = vadd.f32 %v2534_v45, %v2383_v25  ;;  %v2505_v49 = vrot.slane %v4965_v15, 1  ;;  %v4972_v25 = vld [vmem:[#allocation26_spill] sm:$0xff]  ;;  %v4973_v31 = vld [vmem:[#allocation27_spill] sm:$0xff]  ;;  %v4976_v45 = vld [vmem:[#allocation21_spill] sm:$0xff] }
 0x161   : > { %v2506_v20 = vrot.slane %v4966_v9, 1  ;;  %v2508_v58 = vrot.slane %v4967_v21, 1  ;;  %v2500_v47 = vrot.slane %v4968_v13, 1  ;;  %v2501_v43 = vrot.slane %v4969_v52, 1  ;;  %v4974_v30 = vld [vmem:[#allocation19_spill] sm:$0xff] }
 0x162   : > { %v3024_v35 = vpack.c.bf16 %v2603_v18, %v2602_v2  ;;  %3125 = vst [vmem:[%s4766_s12 + $0x48] sm:$0xff] %v3069_v59   ;;  %v3064_v62 = vpack.c.bf16 %v2619_v39, %v2618_v19  ;;  %v2503_v17 = vrot.slane %v4970_v28, 1  ;;  %v2545_v27 = vrot.slane %v4971_v3, 1  ;;  %v4975_v2 = vld [vmem:[#allocation20_spill] sm:$0xff] }
 0x163   : > { %v2507_v54 = vsel %vm716_vm0, %v2505_v49, %v2506_v20  ;;  %v2509_v8 = vsel %vm716_vm0, %v2506_v20, %v2508_v58  ;;  %v2502_v40 = vsel %vm716_vm0, %v2500_v47, %v2501_v43  ;;  %v2546_v4 = vrot.slane %v4972_v25, 1 }
 0x164   : > { %3025 = vst [vmem:[%s4766_s12] sm:$0xff] %v3024_v35   ;;  %3124 = vst [vmem:[%s4766_s12 + $0x40] sm:$0xff] %v3064_v62   ;;  %v2504_v0 = vsel %vm716_vm0, %v2501_v43, %v2503_v17  ;;  %v2548_v36 = vrot.slane %v4973_v31, 1  ;;  %v2540_v38 = vrot.slane %v4974_v30, 1  ;;  %v2541_v18 = vrot.slane %v4975_v2, 1 }
 0x165   : > { %v2543_v19 = vrot.slane %v4976_v45, 1  ;;  %v2547_v62 = vsel %vm716_vm0, %v2545_v27, %v2546_v4  ;;  %v2555_v2 = vrot.slane %v4162_v33, 1  ;;  %v2558_v45 = vrot.slane %v4183_v48, 1 }
 0x166   : > { %v2549_v9 = vsel %vm716_vm0, %v2546_v4, %v2548_v36  ;;  %v2542_v20 = vsel %vm716_vm0, %v2540_v38, %v2541_v18 }
 0x167   : > { %v2544_v13 = vsel %vm716_vm0, %v2541_v18, %v2543_v19  ;;  %v2556_v18 = vrot.slane %v4166_v44, 1  ;;  %v4980_v19 = vld [vmem:[#allocation31_spill] sm:$0xff] }
 0x169   : > { %v2559_v44 = vsel %vm716_vm0, %v2556_v18, %v2558_v45 }
 0x180   : > { %v3178_v22 = vpop.f32.mrb[4].mxu0 }
 0x181   : > { %v2340_v37 = vadd.f32 %v3178_v22, %v4720_v7  ;;  %v2331_v57 = vpop.f32.mrb[5].mxu0 }
 0x182   : > { %v2332_v32 = vadd.f32 %v4720_v7, %v2331_v57  ;;  %v3179_v41 = vpop.f32.mrb[6].mxu0  ;;  %v2515_v57 = vrot.slane %v4091_v26, 1 }
 0x183   : > { %v2343_v53 = vadd.f32 %v3179_v41, %v4720_v7  ;;  %v2334_v34 = vpop.f32.mrb[7].mxu0  ;;  %v2608_v24 = vadd.f32 %v2507_v54, %v2340_v37  ;;  %v2516_v54 = vrot.slane %v4093_v51, 1  ;;  %v4977_v41 = vld [vmem:[#allocation28_spill] sm:$0xff] }
 0x184   : > { %v2335_v1 = vadd.f32 %v4720_v7, %v2334_v34  ;;  %v2606_v50 = vadd.f32 %v2502_v40, %v2332_v32  ;;  %v2518_v32 = vrot.slane %v4110_v42, 1  ;;  %v4978_v40 = vld [vmem:[#allocation29_spill] sm:$0xff]  ;;  %v4979_v34 = vld [vmem:[#allocation30_spill] sm:$0xff] }
 0x185   : > { %v2609_v55 = vadd.f32 %v2509_v8, %v2343_v53  ;;  %v2510_v8 = vrot.slane %v4977_v41, 1  ;;  %v2511_v53 = vrot.slane %v4978_v40, 1  ;;  %v2528_v41 = vrot.slane %v3514_v16, 1 }
 0x186   : > { %v2607_v63 = vadd.f32 %v2504_v0, %v2335_v1  ;;  %v2513_v0 = vrot.slane %v4979_v34, 1  ;;  %v2519_v51 = vsel %vm716_vm0, %v2516_v54, %v2518_v32  ;;  %v2526_v32 = vrot.slane %v3480_v61, 1 }
 0x187   : > { %v3039_v11 = vpack.c.bf16 %v2609_v55, %v2608_v24  ;;  %v2512_v42 = vsel %vm716_vm0, %v2510_v8, %v2511_v53  ;;  %v4983_v8 = vld [vmem:[#allocation33_spill] sm:$0xff]  ;;  %v2523_v34 = vrot.slane %v4261_v23, 1 }
 0x188   : > { %v3034_v46 = vpack.c.bf16 %v2607_v63, %v2606_v50  ;;  %v2517_v50 = vsel %vm716_vm0, %v2515_v57, %v2516_v54  ;;  %v2514_v3 = vsel %vm716_vm0, %v2511_v53, %v2513_v0  ;;  %v4982_v57 = vld [vmem:[#allocation8_spill] sm:$0xff]  ;;  %v2520_v40 = vrot.slane %v4983_v8, 1 }
 0x189   : > { %3119 = vst [vmem:[%s4766_s12 + $0x18] sm:$0xff] %v3039_v11   ;;  %v2525_v54 = vrot.slane %v4982_v57, 1  ;;  %v2521_v53 = vrot.slane %v4259_v6, 1  ;;  %v2529_v61 = vsel %vm716_vm0, %v2526_v32, %v2528_v41 }
 0x18a   : > { %3118 = vst [vmem:[%s4766_s12 + $0x10] sm:$0xff] %v3034_v46  }
 0x18b   : > { %v2522_v16 = vsel %vm716_vm0, %v2520_v40, %v2521_v53  ;;  %v2524_v23 = vsel %vm716_vm0, %v2521_v53, %v2523_v34 }
 0x194   : > { %v3194_v59 = vpop.f32.mrb[4].mxu1 }
 0x195   : > { %v2404_v39 = vadd.f32 %v3194_v59, %v4720_v7  ;;  %v2395_v35 = vpop.f32.mrb[5].mxu1  ;;  %v2550_v59 = vrot.slane %v4980_v19, 1 }
 0x196   : > { %v2396_v15 = vadd.f32 %v4720_v7, %v2395_v35  ;;  %v3195_v49 = vpop.f32.mrb[6].mxu1  ;;  %v4981_v35 = vld [vmem:[#allocation32_spill] sm:$0xff] }
 0x197   : > { %v2407_v21 = vadd.f32 %v3195_v49, %v4720_v7  ;;  %v2398_v58 = vpop.f32.mrb[7].mxu1  ;;  %v2624_v52 = vadd.f32 %v2547_v62, %v2404_v39  ;;  %v2551_v39 = vrot.slane %v4030_v56, 1  ;;  %v2553_v62 = vrot.slane %v4981_v35, 1 }
 0x198   : > { %v2399_v47 = vadd.f32 %v4720_v7, %v2398_v58  ;;  %v2622_v28 = vadd.f32 %v2542_v20, %v2396_v15  ;;  %v2557_v20 = vsel %vm716_vm0, %v2555_v2, %v2556_v18  ;;  %v2563_v2 = vrot.slane %v4341_v10, 1 }
 0x199   : > { %v2625_v43 = vadd.f32 %v2549_v9, %v2407_v21  ;;  %v2552_v48 = vsel %vm716_vm0, %v2550_v59, %v2551_v39 }
 0x19a   : > { %v2623_v17 = vadd.f32 %v2544_v13, %v2399_v47  ;;  %v2554_v13 = vsel %vm716_vm0, %v2551_v39, %v2553_v62 }
 0x19b   : > { %v3079_v22 = vpack.c.bf16 %v2625_v43, %v2624_v52 }
 0x19c   : > { %v3074_v37 = vpack.c.bf16 %v2623_v17, %v2622_v28 }
 0x19d   : > { %3127 = vst [vmem:[%s4766_s12 + $0x58] sm:$0xff] %v3079_v22  }
 0x19e   : > { %3126 = vst [vmem:[%s4766_s12 + $0x50] sm:$0xff] %v3074_v37  }
 0x1d0   : > { %v3182_v1 = vpop.f32.mrb[8].mxu0 }
 0x1d1   : > { %v2356_v24 = vadd.f32 %v3182_v1, %v4720_v7  ;;  %v2347_v55 = vpop.f32.mrb[9].mxu0 }
 0x1d2   : > { %v2348_v26 = vadd.f32 %v4720_v7, %v2347_v55  ;;  %v3183_v63 = vpop.f32.mrb[10].mxu0  ;;  %v2527_v55 = vsel %vm716_vm0, %v2525_v54, %v2526_v32 }
 0x1d3   : > { %v2359_v11 = vadd.f32 %v3183_v63, %v4720_v7  ;;  %v2350_v46 = vpop.f32.mrb[11].mxu0  ;;  %v2612_v25 = vadd.f32 %v2517_v50, %v2356_v24 }
 0x1d4   : > { %v2351_v27 = vadd.f32 %v4720_v7, %v2350_v46  ;;  %v2610_v31 = vadd.f32 %v2512_v42, %v2348_v26 }
 0x1d5   : > { %v2613_v4 = vadd.f32 %v2519_v51, %v2359_v11 }
 0x1d6   : > { %v2611_v36 = vadd.f32 %v2514_v3, %v2351_v27 }
 0x1d7   : > { %v3049_v30 = vpack.c.bf16 %v2613_v4, %v2612_v25  ;;  %v2565_v4 = vrot.slane %v4454_v14, 1 }
 0x1d8   : > { %v3044_v38 = vpack.c.bf16 %v2611_v36, %v2610_v31  ;;  %v2566_v31 = vrot.slane %v4456_v29, 1  ;;  %v2568_v36 = vrot.slane %v4489_v60, 1 }
 0x1d9   : > { %3121 = vst [vmem:[%s4766_s12 + $0x28] sm:$0xff] %v3049_v30   ;;  %v2560_v30 = vrot.slane %v4335_v12, 1 }
 0x1da   : > { %3120 = vst [vmem:[%s4766_s12 + $0x20] sm:$0xff] %v3044_v38   ;;  %v2561_v38 = vrot.slane %v4337_v5, 1  ;;  %v2567_v59 = vsel %vm716_vm0, %v2565_v4, %v2566_v31  ;;  %v2569_v29 = vsel %vm716_vm0, %v2566_v31, %v2568_v36 }
 0x1dc   : > { %v2562_v60 = vsel %vm716_vm0, %v2560_v30, %v2561_v38  ;;  %v2564_v10 = vsel %vm716_vm0, %v2561_v38, %v2563_v2 }
 0x1e4   : > { %v3198_v15 = vpop.f32.mrb[8].mxu1 }
 0x1e5   : > { %v2420_v49 = vadd.f32 %v3198_v15, %v4720_v7  ;;  %v2411_v9 = vpop.f32.mrb[9].mxu1 }
 0x1e6   : > { %v2412_v33 = vadd.f32 %v4720_v7, %v2411_v9  ;;  %v3199_v21 = vpop.f32.mrb[10].mxu1 }
 0x1e7   : > { %v2423_v58 = vadd.f32 %v3199_v21, %v4720_v7  ;;  %v2414_v56 = vpop.f32.mrb[11].mxu1  ;;  %v2628_v52 = vadd.f32 %v2557_v20, %v2420_v49 }
 0x1e8   : > { %v2415_v47 = vadd.f32 %v4720_v7, %v2414_v56  ;;  %v2626_v28 = vadd.f32 %v2552_v48, %v2412_v33 }
 0x1e9   : > { %v2629_v43 = vadd.f32 %v2559_v44, %v2423_v58 }
 0x1ea   : > { %v2627_v17 = vadd.f32 %v2554_v13, %v2415_v47 }
 0x1eb   : > { %v3089_v22 = vpack.c.bf16 %v2629_v43, %v2628_v52 }
 0x1ec   : > { %v3084_v37 = vpack.c.bf16 %v2627_v17, %v2626_v28 }
 0x1ed   : > { %3129 = vst [vmem:[%s4766_s12 + $0x68] sm:$0xff] %v3089_v22  }
 0x1ee   : > { %3128 = vst [vmem:[%s4766_s12 + $0x60] sm:$0xff] %v3084_v37  }
 0x21e   : > { %v3186_v0 = vpop.f32.mrb[12].mxu0 }
 0x21f   : > { %v2372_v1 = vadd.f32 %v3186_v0, %v4720_v7  ;;  %v2363_v24 = vpop.f32.mrb[13].mxu0 }
 0x220   : > { %v2364_v50 = vadd.f32 %v4720_v7, %v2363_v24  ;;  %v3187_v26 = vpop.f32.mrb[14].mxu0 }
 0x221   : > { %v2375_v63 = vadd.f32 %v3187_v26, %v4720_v7  ;;  %v2366_v6 = vpop.f32.mrb[15].mxu0  ;;  %v2616_v42 = vadd.f32 %v2527_v55, %v2372_v1 }
 0x222   : > { %v2367_v51 = vadd.f32 %v4720_v7, %v2366_v6  ;;  %v2614_v46 = vadd.f32 %v2522_v16, %v2364_v50 }
 0x223   : > { %v2617_v11 = vadd.f32 %v2529_v61, %v2375_v63 }
 0x224   : > { %v2615_v3 = vadd.f32 %v2524_v23, %v2367_v51 }
 0x225   : > { %v3059_v27 = vpack.c.bf16 %v2617_v11, %v2616_v42 }
 0x226   : > { %v3054_v25 = vpack.c.bf16 %v2615_v3, %v2614_v46 }
 0x227   : > { %3123 = vst [vmem:[%s4766_s12 + $0x38] sm:$0xff] %v3059_v27  }
 0x228   : > { %3122 = vst [vmem:[%s4766_s12 + $0x30] sm:$0xff] %v3054_v25  }
 0x233   : > { %v3202_v18 = vpop.f32.mrb[12].mxu1 }
 0x234   : > { %v2436_v45 = vadd.f32 %v3202_v18, %v4720_v7  ;;  %v2427_v19 = vpop.f32.mrb[13].mxu1 }
 0x235   : > { %v2428_v14 = vadd.f32 %v4720_v7, %v2427_v19  ;;  %v3203_v39 = vpop.f32.mrb[14].mxu1 }
 0x236   : > { %v2439_v12 = vadd.f32 %v3203_v39, %v4720_v7  ;;  %v2430_v5 = vpop.f32.mrb[15].mxu1  ;;  %v2632_v62 = vadd.f32 %v2567_v59, %v2436_v45 }
 0x237   : > { %v2431_v35 = vadd.f32 %v4720_v7, %v2430_v5  ;;  %v2630_v49 = vadd.f32 %v2562_v60, %v2428_v14 }
 0x238   : > { %v2633_v15 = vadd.f32 %v2569_v29, %v2439_v12 }
 0x239   : > { %v2631_v9 = vadd.f32 %v2564_v10, %v2431_v35 }
 0x23a   : > { %v3099_v20 = vpack.c.bf16 %v2633_v15, %v2632_v62 }
 0x23b   : > { %v3094_v33 = vpack.c.bf16 %v2631_v9, %v2630_v49 }
 0x23c   : > { %3131 = vst [vmem:[%s4766_s12 + $0x78] sm:$0xff] %v3099_v20  }
 0x23d   : > { %3130 = vst [vmem:[%s4766_s12 + $0x70] sm:$0xff] %v3094_v33  }
 0x23e PF: > { %s15_s18 = sadd.s32 1, %s3263_s18  }
 0x23f   : > { %p12_p4 = scmp.ge.s32.totalorder %s15_s18, 4  }
 0x241   :  { %14 = sbr.rel (!%p12_p4) target bundleno = 1 (0x1), region = 72 }

</bundles_post_ra>
